<compile_context>
chip_gen: v7x
topology: tpu7x:2x2x1
jax: 0.10.0
libtpu: 0.0.40
codegen_flags: <defaults>
</compile_context>

<pallas_src>
import functools

import jax
import jax.numpy as jnp
from jax.experimental import pallas as pl
from jax.experimental.pallas import tpu as pltpu

PD_PAD = 128   # padded pose lanes   (rot(3) + ncomps)
FP_PAD = 128   # padded full_pose lanes (48)


def _round_up(x, m):
    return (x + m - 1) // m * m


# ----------------------------------------------------------------------------
# Fused kernel: tiled conv matmul + streaming GAP + (MLP + MANO-PCA) epilogue
# ----------------------------------------------------------------------------
def _mano_net_kernel(sides_ref,                                   # SMEM scalar prefetch [B] int32
                     patches_ref, cw_ref, cb_ref,                 # conv: [1,TM,KP] bf16, [KP,F0P] bf16, [1,F0P] f32
                     w1_ref, b1_ref, wp_ref, bp_ref,              # ManoBranch MLP (f32)
                     mr_ref, ml_ref, meanr_ref, meanl_ref,        # rot-passthrough + PCA comps per side (f32)
                     pose_ref, full_ref,                          # outputs [1,1,PD_PAD] / [1,1,FP_PAD] f32
                     acc_ref,                                     # VMEM scratch [8, F0P] f32 (pooled partial sums)
                     *, hw, tm, nt, inv_hw):
    b = pl.program_id(0)
    t = pl.program_id(1)

    @pl.when(t == 0)
    def _init():
        acc_ref[...] = jnp.zeros_like(acc_ref)

    # --- conv as im2col matmul: bf16 operands, f32 accumulation (MXU) --------
    y = jnp.dot(patches_ref[0], cw_ref[...], preferred_element_type=jnp.float32)
    y = jnp.maximum(y + cb_ref[...], 0.0)                          # bias + ReLU (f32)

    # Rows that are tile padding beyond H*W would contribute relu(bias): mask them.
    row = t * tm + jax.lax.broadcasted_iota(jnp.int32, (tm, 1), 0)
    y = jnp.where(row < hw, y, 0.0)

    # --- streaming global-average-pool partial sum (sublane-aligned VPU adds) -
    acc_ref[...] += y.reshape(tm // 8, 8, y.shape[-1]).sum(axis=0)

    # --- fused ManoBranch epilogue on the last row tile of this sample -------
    @pl.when(t == nt - 1)
    def _epilogue():
        feat = acc_ref[...].sum(axis=0, keepdims=True) * inv_hw    # [1, F0P] f32
        h = jnp.dot(feat, w1_ref[...], preferred_element_type=jnp.float32) + b1_ref[...]
        h = jnp.maximum(h, 0.0)                                    # base_layer (Linear+ReLU)
        pose = jnp.dot(h, wp_ref[...], preferred_element_type=jnp.float32) + bp_ref[...]
        pose_ref[0] = pose                                         # [1, PD_PAD] (lane-padded)

        # full_pose = concat([rot, pca @ comps + hands_mean]); the concat and
        # rot passthrough are folded into the padded selection matrices M_{r,l}.
        full_r = jnp.dot(pose, mr_ref[...], preferred_element_type=jnp.float32) + meanr_ref[...]
        full_l = jnp.dot(pose, ml_ref[...], preferred_element_type=jnp.float32) + meanl_ref[...]
        is_right = sides_ref[b] == 0
        full_ref[0] = jnp.where(is_right, full_r, full_l)          # [1, FP_PAD]


# ----------------------------------------------------------------------------
# Wrapper: layout glue (NCHW->NHWC, im2col, zero padding) + pallas_call
# ----------------------------------------------------------------------------
def _im2col_3x3(x_nhwc):
    """3x3 same-padding patches: [B, H*W, 9*Cin] (kernel-pos major, channel minor)."""
    B, H, W, C = x_nhwc.shape
    xp = jnp.pad(x_nhwc, ((0, 0), (1, 1), (1, 1), (0, 0)))
    cols = [xp[:, dy:dy + H, dx:dx + W, :] for dy in range(3) for dx in range(3)]
    patches = jnp.stack(cols, axis=3)                              # [B, H, W, 9, C]
    return patches.reshape(B, H * W, 9 * C)


def _pad2(a, rows, cols):
    return jnp.pad(a, ((0, rows - a.shape[0]), (0, cols - a.shape[1])))


def _build_side_mats(comps, hands_mean, ncomps):
    """Padded matrix folding rot passthrough + PCA->45d mapping into one matmul."""
    m = jnp.zeros((PD_PAD, FP_PAD), jnp.float32)
    m = m.at[:3, :3].set(jnp.eye(3, dtype=jnp.float32))            # rot passthrough
    m = m.at[3:3 + ncomps, 3:3 + 45].set(comps.astype(jnp.float32))
    mean = jnp.zeros((1, FP_PAD), jnp.float32)
    mean = mean.at[0, 3:3 + 45].set(hands_mean.reshape(-1).astype(jnp.float32))
    return m, mean


def mano_net_forward(images_nchw, sides, params, *, max_row_tile=1024):
    B, Cin, H, W = images_nchw.shape
    HW = H * W
    F0 = params["conv_w"].shape[-1]
    F1 = params["w1"].shape[-1]
    ncomps = params["comps_r"].shape[0]
    pose_dim = ncomps + 3

    KP = _round_up(9 * Cin, 128)            # MXU-friendly K
    F0P = _round_up(F0, 128)                # lane-dense conv out / feature dim
    F1P = _round_up(F1, 128)

    # Row tile: multiple of 8, bounded so double-buffered patch tiles stay
    # well under the v7x (64 MiB physical) scoped-VMEM budget.
    TM = min(max_row_tile, _round_up(HW, 8))
    while TM > 8 and 2 * TM * KP * 2 > (8 << 20):
        TM = _round_up(TM // 2, 8)
    NT = (HW + TM - 1) // TM
    HWP = NT * TM

    # ---- glue: layout, im2col (bf16), zero-padding to MXU-friendly shapes ----
    x = jnp.transpose(images_nchw, (0, 2, 3, 1))                   # NCHW -> NHWC
    patches = _im2col_3x3(x).astype(jnp.bfloat16)                  # [B, HW, 9Cin]
    patches = jnp.pad(patches, ((0, 0), (0, HWP - HW), (0, KP - 9 * Cin)))

    cw = _pad2(params["conv_w"].reshape(9 * Cin, F0), KP, F0P).astype(jnp.bfloat16)
    cb = _pad2(params["conv_b"].reshape(1, F0), 1, F0P).astype(jnp.float32)
    w1 = _pad2(params["w1"], F0P, F1P).astype(jnp.float32)
    b1 = _pad2(params["b1"].reshape(1, F1), 1, F1P).astype(jnp.float32)
    wp = _pad2(params["wp"], F1P, PD_PAD).astype(jnp.float32)
    bp = _pad2(params["bp"].reshape(1, pose_dim), 1, PD_PAD).astype(jnp.float32)
    m_r, mean_r = _build_side_mats(params["comps_r"], params["mean_r"], ncomps)
    m_l, mean_l = _build_side_mats(params["comps_l"], params["mean_l"], ncomps)

    sides_flat = sides.reshape(-1).astype(jnp.int32)               # [B] 0=right 1=left

    kern = functools.partial(_mano_net_kernel, hw=HW, tm=TM, nt=NT, inv_hw=1.0 / HW)

    pinned = lambda b, t, s: (0, 0)
    grid_spec = pltpu.PrefetchScalarGridSpec(
        num_scalar_prefetch=1,
        grid=(B, NT),
        in_specs=[
            pl.BlockSpec((1, TM, KP), lambda b, t, s: (b, t, 0)),  # im2col patches (bf16)
            pl.BlockSpec((KP, F0P), pinned),                       # conv W (bf16)
            pl.BlockSpec((1, F0P), pinned),                        # conv b
            pl.BlockSpec((F0P, F1P), pinned),                      # W1
            pl.BlockSpec((1, F1P), pinned),                        # b1
            pl.BlockSpec((F1P, PD_PAD), pinned),                   # Wp
            pl.BlockSpec((1, PD_PAD), pinned),                     # bp
            pl.BlockSpec((PD_PAD, FP_PAD), pinned),                # M_right
            pl.BlockSpec((PD_PAD, FP_PAD), pinned),                # M_left
            pl.BlockSpec((1, FP_PAD), pinned),                     # mean_right
            pl.BlockSpec((1, FP_PAD), pinned),                     # mean_left
        ],
        out_specs=(
            pl.BlockSpec((1, 1, PD_PAD), lambda b, t, s: (b, 0, 0)),
            pl.BlockSpec((1, 1, FP_PAD), lambda b, t, s: (b, 0, 0)),
        ),
        scratch_shapes=[pltpu.VMEM((8, F0P), jnp.float32)],
    )

    # VMEM budget: double-buffered patch tile + resident weights + scratch (+ slack).
    vmem_bytes = (2 * TM * KP * 2 + 2 * KP * F0P * 2
                  + 4 * (F0P * F1P + F1P * PD_PAD + 2 * PD_PAD * FP_PAD)
                  + 4 * (9 * F0P + F1P + PD_PAD + 4 * FP_PAD)
                  + (1 << 20))
    compiler_params = pltpu.CompilerParams(
        dimension_semantics=("parallel", "arbitrary"),   # batch parallel (v7x 2 TCs), HW reduction arbitrary
        vmem_limit_bytes=int(min(max(4 * vmem_bytes, 8 << 20), 64 << 20)),
    )

    pose_pad, full_pad = pl.pallas_call(
        kern,
        out_shape=(jax.ShapeDtypeStruct((B, 1, PD_PAD), jnp.float32),
                   jax.ShapeDtypeStruct((B, 1, FP_PAD), jnp.float32)),
        grid_spec=grid_spec,
        compiler_params=compiler_params,
    )(sides_flat, patches, cw, cb, w1, b1, wp, bp, m_r, m_l, mean_r, mean_l)

    pose = pose_pad.reshape(B, PD_PAD)[:, :pose_dim]
    full_pose = full_pad.reshape(B, FP_PAD)[:, :48]
    return {"pose": pose, "full_pose": full_pose, "shape": None, "trans": None}


# ----------------------------------------------------------------------------
# Pure-JAX f32 reference (for correctness check) and parameter setup
# ----------------------------------------------------------------------------
def mano_net_reference(images_nchw, sides, params):
    B, Cin, H, W = images_nchw.shape
    x = jnp.transpose(images_nchw, (0, 2, 3, 1))
    patches = _im2col_3x3(x)                                       # f32
    w2d = params["conv_w"].reshape(9 * Cin, -1)
    y = jnp.maximum(patches @ w2d + params["conv_b"], 0.0)         # [B, HW, F0]
    feats = y.mean(axis=1)                                         # global average pool
    h = jnp.maximum(feats @ params["w1"] + params["b1"], 0.0)
    pose = h @ params["wp"] + params["bp"]
    rot, pca = pose[:, :3], pose[:, 3:]
    hand_r = pca @ params["comps_r"] + params["mean_r"]
    hand_l = pca @ params["comps_l"] + params["mean_l"]
    is_right = sides.reshape(-1, 1) == 0
    hand = jnp.where(is_right, hand_r, hand_l)
    return pose, jnp.concatenate([rot, hand], axis=-1)


def init_params(key, cin, base_neurons, ncomps):
    f0, f1 = base_neurons
    pose_dim = ncomps + 3
    ks = jax.random.split(key, 10)
    n = lambda k, shp, s=0.1: (s * jax.random.normal(k, shp)).astype(jnp.float32)
    return {
        "conv_w": n(ks[0], (3, 3, cin, f0)),      # conv 3x3, Cin -> F0 (HWIO)
        "conv_b": n(ks[1], (1, f0), 0.01),
        "w1":     n(ks[2], (f0, f1)),             # base_layer Linear
        "b1":     n(ks[3], (1, f1), 0.01),
        "wp":     n(ks[4], (f1, pose_dim)),       # pose_reg Linear
        "bp":     n(ks[5], (1, pose_dim), 0.01),
        "comps_r": n(ks[6], (ncomps, 45)),        # synthetic MANO PCA comps (right)
        "comps_l": n(ks[7], (ncomps, 45)),        # synthetic MANO PCA comps (left)
        "mean_r": n(ks[8], (1, 45), 0.05),        # synthetic hands_mean (right)
        "mean_l": n(ks[9], (1, 45), 0.05),        # synthetic hands_mean (left)
    }


if __name__ == "__main__":
    B, Cin, H, W = 2, 4, 16, 16
    base_neurons = [32, 16]
    ncomps = 6

    key = jax.random.PRNGKey(0)
    k_img, k_par = jax.random.split(key)
    images = jax.random.normal(k_img, (B, Cin, H, W), dtype=jnp.float32)  # NCHW
    sides = jnp.array([[0], [1]], dtype=jnp.int32)                        # right, left

    params = init_params(k_par, Cin, base_neurons, ncomps)

    results = mano_net_forward(images, sides, params)
    jax.block_until_ready(results["pose"])
    jax.block_until_ready(results["full_pose"])

    assert results["pose"].shape == (B, ncomps + 3)
    assert results["full_pose"].shape == (B, 48)

    # Validate against a pure-JAX f32 reference (bf16 conv operands -> loose tol).
    pose_ref, full_ref = mano_net_reference(images, sides, params)
    err_p = float(jnp.max(jnp.abs(results["pose"] - pose_ref)))
    err_f = float(jnp.max(jnp.abs(results["full_pose"] - full_ref)))
    assert err_p < 5e-2 and err_f < 5e-2, (err_p, err_f)

    print("KERNEL_OK")
</pallas_src>

<mosaic_0001>
module attributes {stable_mosaic.version = 11 : i64} {
  func.func @_mano_net_kernel(%arg0: i32, %arg1: i32, %arg2: memref<2xi32, #tpu.memory_space<smem>>, %arg3: memref<1x256x128xbf16, #tpu.memory_space<vmem>>, %arg4: memref<128x128xbf16, #tpu.memory_space<vmem>>, %arg5: memref<1x128xf32, #tpu.memory_space<vmem>>, %arg6: memref<128x128xf32, #tpu.memory_space<vmem>>, %arg7: memref<1x128xf32, #tpu.memory_space<vmem>>, %arg8: memref<128x128xf32, #tpu.memory_space<vmem>>, %arg9: memref<1x128xf32, #tpu.memory_space<vmem>>, %arg10: memref<128x128xf32, #tpu.memory_space<vmem>>, %arg11: memref<128x128xf32, #tpu.memory_space<vmem>>, %arg12: memref<1x128xf32, #tpu.memory_space<vmem>>, %arg13: memref<1x128xf32, #tpu.memory_space<vmem>>, %arg14: memref<1x1x128xf32, #tpu.memory_space<vmem>>, %arg15: memref<1x1x128xf32, #tpu.memory_space<vmem>>, %arg16: memref<8x128xf32, #tpu.memory_space<vmem>>) attributes {dimension_semantics = [#tpu.dimension_semantics<parallel>, #tpu.dimension_semantics<arbitrary>], iteration_bounds = array<i64: 2, 1>, scalar_prefetch = 1 : i64, scratch_operands = 1 : i64, tpu.core_type = #tpu.core_type<tc>, window_params = [{transform_indices = @transform_0, window_bounds = array<i64: 1, 256, 128>}, {pipeline_mode = #tpu.pipeline_mode<synchronous>, transform_indices = @transform_1, window_bounds = array<i64: 128, 128>}, {pipeline_mode = #tpu.pipeline_mode<synchronous>, transform_indices = @transform_2, window_bounds = array<i64: 1, 128>}, {pipeline_mode = #tpu.pipeline_mode<synchronous>, transform_indices = @transform_3, window_bounds = array<i64: 128, 128>}, {pipeline_mode = #tpu.pipeline_mode<synchronous>, transform_indices = @transform_4, window_bounds = array<i64: 1, 128>}, {pipeline_mode = #tpu.pipeline_mode<synchronous>, transform_indices = @transform_5, window_bounds = array<i64: 128, 128>}, {pipeline_mode = #tpu.pipeline_mode<synchronous>, transform_indices = @transform_6, window_bounds = array<i64: 1, 128>}, {pipeline_mode = #tpu.pipeline_mode<synchronous>, transform_indices = @transform_7, window_bounds = array<i64: 128, 128>}, {pipeline_mode = #tpu.pipeline_mode<synchronous>, transform_indices = @transform_8, window_bounds = array<i64: 128, 128>}, {pipeline_mode = #tpu.pipeline_mode<synchronous>, transform_indices = @transform_9, window_bounds = array<i64: 1, 128>}, {pipeline_mode = #tpu.pipeline_mode<synchronous>, transform_indices = @transform_10, window_bounds = array<i64: 1, 128>}, {transform_indices = @transform_11, window_bounds = array<i64: 1, 1, 128>}, {transform_indices = @transform_12, window_bounds = array<i64: 1, 1, 128>}]} {
    %c0_i32 = arith.constant 0 : i32
    %0 = arith.cmpi eq, %arg1, %c0_i32 : i32
    %1 = arith.extui %0 : i1 to i32
    %c0_i32_0 = arith.constant 0 : i32
    %2 = arith.cmpi ne, %1, %c0_i32_0 : i32
    scf.if %2 {
      %cst_17 = arith.constant 0.000000e+00 : f32
      %30 = vector.broadcast %cst_17 : f32 to vector<8x128xf32>
      %c0_18 = arith.constant 0 : index
      %c0_19 = arith.constant 0 : index
      %31 = vector.load %arg16[%c0_18, %c0_19] : memref<8x128xf32, #tpu.memory_space<vmem>>, vector<8x128xf32>
      tpu.vector_store %arg16[%c0_18, %c0_19], %30 {strides = array<i32>} : memref<8x128xf32, #tpu.memory_space<vmem>>, vector<8x128xf32>,
    } else {
    }
    %c0 = arith.constant 0 : index
    %c0_1 = arith.constant 0 : index
    %c0_2 = arith.constant 0 : index
    %3 = vector.load %arg3[%c0, %c0_1, %c0_2] : memref<1x256x128xbf16, #tpu.memory_space<vmem>>, vector<1x256x128xbf16>
    %4 = vector.shape_cast %3 : vector<1x256x128xbf16> to vector<256x128xbf16>
    %c0_3 = arith.constant 0 : index
    %c0_4 = arith.constant 0 : index
    %5 = vector.load %arg4[%c0_3, %c0_4] : memref<128x128xbf16, #tpu.memory_space<vmem>>, vector<128x128xbf16>
    %cst = arith.constant dense<0.000000e+00> : vector<256x128xf32>
    %6 = tpu.matmul %4, %5, %cst {dimension_numbers = #tpu.dot_dimension_numbers<[1], [0], [0], [1], [0, 0, 1, 1], [], []>} : vector<256x128xbf16>, vector<128x128xbf16>, vector<256x128xf32> -> vector<256x128xf32>
    %c0_5 = arith.constant 0 : index
    %c0_6 = arith.constant 0 : index
    %7 = vector.load %arg5[%c0_5, %c0_6] : memref<1x128xf32, #tpu.memory_space<vmem>>, vector<1x128xf32>
    %8 = vector.broadcast %7 : vector<1x128xf32> to vector<256x128xf32>
    %9 = arith.addf %6, %8 : vector<256x128xf32>
    %cst_7 = arith.constant 0.000000e+00 : f32
    %10 = vector.broadcast %cst_7 : f32 to vector<256x128xf32>
    %11 = arith.maximumf %9, %10 : vector<256x128xf32>
    %c256_i32 = arith.constant 256 : i32
    %12 = arith.muli %arg1, %c256_i32 : i32
    %13 = tpu.iota {dimensions = array<i32: 0>} : vector<256x1xi32>
    %14 = vector.broadcast %12 : i32 to vector<256x1xi32>
    %15 = arith.addi %14, %13 : vector<256x1xi32>
    %c256_i32_8 = arith.constant 256 : i32
    %16 = vector.broadcast %c256_i32_8 : i32 to vector<256x1xi32>
    %17 = arith.cmpi slt, %15, %16 : vector<256x1xi32>
    %cst_9 = arith.constant 0.000000e+00 : f32
    %18 = vector.shape_cast %17 : vector<256x1xi1> to vector<256x1xi1>
    %19 = vector.broadcast %18 : vector<256x1xi1> to vector<256x128xi1>
    %20 = vector.broadcast %cst_9 : f32 to vector<256x128xf32>
    %21 = arith.select %19, %11, %20 : vector<256x128xi1>, vector<256x128xf32>
    %c0_10 = arith.constant 0 : index
    %c0_11 = arith.constant 0 : index
    %22 = vector.load %arg16[%c0_10, %c0_11] : memref<8x128xf32, #tpu.memory_space<vmem>>, vector<8x128xf32>
    %23 = vector.shape_cast %21 : vector<256x128xf32> to vector<32x8x128xf32>
    %cst_12 = arith.constant dense<0.000000e+00> : vector<8x128xf32>
    %24 = vector.multi_reduction <add>, %23, %cst_12 [0] : vector<32x8x128xf32> to vector<8x128xf32>
    %25 = arith.addf %22, %24 : vector<8x128xf32>
    %c0_13 = arith.constant 0 : index
    %c0_14 = arith.constant 0 : index
    %26 = vector.load %arg16[%c0_13, %c0_14] : memref<8x128xf32, #tpu.memory_space<vmem>>, vector<8x128xf32>
    tpu.vector_store %arg16[%c0_13, %c0_14], %25 {strides = array<i32>} : memref<8x128xf32, #tpu.memory_space<vmem>>, vector<8x128xf32>,
    %c0_i32_15 = arith.constant 0 : i32
    %27 = arith.cmpi eq, %arg1, %c0_i32_15 : i32
    %28 = arith.extui %27 : i1 to i32
    %c0_i32_16 = arith.constant 0 : i32
    %29 = arith.cmpi ne, %28, %c0_i32_16 : i32
    scf.if %29 {
      %c0_17 = arith.constant 0 : index
      %c0_18 = arith.constant 0 : index
      %30 = vector.load %arg16[%c0_17, %c0_18] : memref<8x128xf32, #tpu.memory_space<vmem>>, vector<8x128xf32>
      %cst_19 = arith.constant dense<0.000000e+00> : vector<128xf32>
      %31 = vector.multi_reduction <add>, %30, %cst_19 [0] : vector<8x128xf32> to vector<128xf32>
      %32 = vector.shape_cast %31 : vector<128xf32> to vector<1x128xf32>
      %cst_20 = arith.constant 3.906250e-03 : f32
      %33 = vector.broadcast %cst_20 : f32 to vector<1x128xf32>
      %34 = arith.mulf %32, %33 : vector<1x128xf32>
      %c0_21 = arith.constant 0 : index
      %c0_22 = arith.constant 0 : index
      %35 = vector.load %arg6[%c0_21, %c0_22] : memref<128x128xf32, #tpu.memory_space<vmem>>, vector<128x128xf32>
      %cst_23 = arith.constant dense<0.000000e+00> : vector<1x128xf32>
      %36 = tpu.matmul %34, %35, %cst_23 {dimension_numbers = #tpu.dot_dimension_numbers<[1], [0], [0], [1], [0, 0, 1, 1], [], []>} : vector<1x128xf32>, vector<128x128xf32>, vector<1x128xf32> -> vector<1x128xf32>
      %c0_24 = arith.constant 0 : index
      %c0_25 = arith.constant 0 : index
      %37 = vector.load %arg7[%c0_24, %c0_25] : memref<1x128xf32, #tpu.memory_space<vmem>>, vector<1x128xf32>
      %38 = arith.addf %36, %37 : vector<1x128xf32>
      %cst_26 = arith.constant 0.000000e+00 : f32
      %39 = vector.broadcast %cst_26 : f32 to vector<1x128xf32>
      %40 = arith.maximumf %38, %39 : vector<1x128xf32>
      %c0_27 = arith.constant 0 : index
      %c0_28 = arith.constant 0 : index
      %41 = vector.load %arg8[%c0_27, %c0_28] : memref<128x128xf32, #tpu.memory_space<vmem>>, vector<128x128xf32>
      %cst_29 = arith.constant dense<0.000000e+00> : vector<1x128xf32>
      %42 = tpu.matmul %40, %41, %cst_29 {dimension_numbers = #tpu.dot_dimension_numbers<[1], [0], [0], [1], [0, 0, 1, 1], [], []>} : vector<1x128xf32>, vector<128x128xf32>, vector<1x128xf32> -> vector<1x128xf32>
      %c0_30 = arith.constant 0 : index
      %c0_31 = arith.constant 0 : index
      %43 = vector.load %arg9[%c0_30, %c0_31] : memref<1x128xf32, #tpu.memory_space<vmem>>, vector<1x128xf32>
      %44 = arith.addf %42, %43 : vector<1x128xf32>
      %c0_32 = arith.constant 0 : index
      %c0_33 = arith.constant 0 : index
      %c0_34 = arith.constant 0 : index
      %45 = vector.load %arg14[%c0_32, %c0_33, %c0_34] : memref<1x1x128xf32, #tpu.memory_space<vmem>>, vector<1x1x128xf32>
      %46 = vector.shape_cast %45 : vector<1x1x128xf32> to vector<1x128xf32>
      %47 = vector.shape_cast %44 : vector<1x128xf32> to vector<1x1x128xf32>
      tpu.vector_store %arg14[%c0_32, %c0_33, %c0_34], %47 {strides = array<i32>} : memref<1x1x128xf32, #tpu.memory_space<vmem>>, vector<1x1x128xf32>,
      %c0_35 = arith.constant 0 : index
      %c0_36 = arith.constant 0 : index
      %48 = vector.load %arg10[%c0_35, %c0_36] : memref<128x128xf32, #tpu.memory_space<vmem>>, vector<128x128xf32>
      %cst_37 = arith.constant dense<0.000000e+00> : vector<1x128xf32>
      %49 = tpu.matmul %44, %48, %cst_37 {dimension_numbers = #tpu.dot_dimension_numbers<[1], [0], [0], [1], [0, 0, 1, 1], [], []>} : vector<1x128xf32>, vector<128x128xf32>, vector<1x128xf32> -> vector<1x128xf32>
      %c0_38 = arith.constant 0 : index
      %c0_39 = arith.constant 0 : index
      %50 = vector.load %arg12[%c0_38, %c0_39] : memref<1x128xf32, #tpu.memory_space<vmem>>, vector<1x128xf32>
      %51 = arith.addf %49, %50 : vector<1x128xf32>
      %c0_40 = arith.constant 0 : index
      %c0_41 = arith.constant 0 : index
      %52 = vector.load %arg11[%c0_40, %c0_41] : memref<128x128xf32, #tpu.memory_space<vmem>>, vector<128x128xf32>
      %cst_42 = arith.constant dense<0.000000e+00> : vector<1x128xf32>
      %53 = tpu.matmul %44, %52, %cst_42 {dimension_numbers = #tpu.dot_dimension_numbers<[1], [0], [0], [1], [0, 0, 1, 1], [], []>} : vector<1x128xf32>, vector<128x128xf32>, vector<1x128xf32> -> vector<1x128xf32>
      %c0_43 = arith.constant 0 : index
      %c0_44 = arith.constant 0 : index
      %54 = vector.load %arg13[%c0_43, %c0_44] : memref<1x128xf32, #tpu.memory_space<vmem>>, vector<1x128xf32>
      %55 = arith.addf %53, %54 : vector<1x128xf32>
      %56 = arith.index_cast %arg0 : i32 to index
      %57 = memref.load %arg2[%56] : memref<2xi32, #tpu.memory_space<smem>>
      %c0_i32_45 = arith.constant 0 : i32
      %58 = arith.cmpi eq, %57, %c0_i32_45 : i32
      %59 = arith.select %58, %51, %55 : vector<1x128xf32>
      %c0_46 = arith.constant 0 : index
      %c0_47 = arith.constant 0 : index
      %c0_48 = arith.constant 0 : index
      %60 = vector.load %arg15[%c0_46, %c0_47, %c0_48] : memref<1x1x128xf32, #tpu.memory_space<vmem>>, vector<1x1x128xf32>
      %61 = vector.shape_cast %60 : vector<1x1x128xf32> to vector<1x128xf32>
      %62 = vector.shape_cast %59 : vector<1x128xf32> to vector<1x1x128xf32>
      tpu.vector_store %arg15[%c0_46, %c0_47, %c0_48], %62 {strides = array<i32>} : memref<1x1x128xf32, #tpu.memory_space<vmem>>, vector<1x1x128xf32>,
    } else {
    }
    return
  }
  func.func @transform_0(%arg0: i32, %arg1: i32, %arg2: memref<2xi32, #tpu.memory_space<smem>>) -> (i32, i32, i32) {
    %c0_i32 = arith.constant 0 : i32
    %c0_i32_0 = arith.constant 0 : i32
    return %arg0, %arg1, %c0_i32 : i32, i32, i32
  }
  func.func @transform_1(%arg0: i32, %arg1: i32, %arg2: memref<2xi32, #tpu.memory_space<smem>>) -> (i32, i32) {
    %c0_i32 = arith.constant 0 : i32
    %c0_i32_0 = arith.constant 0 : i32
    %c0_i32_1 = arith.constant 0 : i32
    return %c0_i32, %c0_i32_0 : i32, i32
  }
  func.func @transform_2(%arg0: i32, %arg1: i32, %arg2: memref<2xi32, #tpu.memory_space<smem>>) -> (i32, i32) {
    %c0_i32 = arith.constant 0 : i32
    %c0_i32_0 = arith.constant 0 : i32
    %c0_i32_1 = arith.constant 0 : i32
    return %c0_i32, %c0_i32_0 : i32, i32
  }
  func.func @transform_3(%arg0: i32, %arg1: i32, %arg2: memref<2xi32, #tpu.memory_space<smem>>) -> (i32, i32) {
    %c0_i32 = arith.constant 0 : i32
    %c0_i32_0 = arith.constant 0 : i32
    %c0_i32_1 = arith.constant 0 : i32
    return %c0_i32, %c0_i32_0 : i32, i32
  }
  func.func @transform_4(%arg0: i32, %arg1: i32, %arg2: memref<2xi32, #tpu.memory_space<smem>>) -> (i32, i32) {
    %c0_i32 = arith.constant 0 : i32
    %c0_i32_0 = arith.constant 0 : i32
    %c0_i32_1 = arith.constant 0 : i32
    return %c0_i32, %c0_i32_0 : i32, i32
  }
  func.func @transform_5(%arg0: i32, %arg1: i32, %arg2: memref<2xi32, #tpu.memory_space<smem>>) -> (i32, i32) {
    %c0_i32 = arith.constant 0 : i32
    %c0_i32_0 = arith.constant 0 : i32
    %c0_i32_1 = arith.constant 0 : i32
    return %c0_i32, %c0_i32_0 : i32, i32
  }
  func.func @transform_6(%arg0: i32, %arg1: i32, %arg2: memref<2xi32, #tpu.memory_space<smem>>) -> (i32, i32) {
    %c0_i32 = arith.constant 0 : i32
    %c0_i32_0 = arith.constant 0 : i32
    %c0_i32_1 = arith.constant 0 : i32
    return %c0_i32, %c0_i32_0 : i32, i32
  }
  func.func @transform_7(%arg0: i32, %arg1: i32, %arg2: memref<2xi32, #tpu.memory_space<smem>>) -> (i32, i32) {
    %c0_i32 = arith.constant 0 : i32
    %c0_i32_0 = arith.constant 0 : i32
    %c0_i32_1 = arith.constant 0 : i32
    return %c0_i32, %c0_i32_0 : i32, i32
  }
  func.func @transform_8(%arg0: i32, %arg1: i32, %arg2: memref<2xi32, #tpu.memory_space<smem>>) -> (i32, i32) {
    %c0_i32 = arith.constant 0 : i32
    %c0_i32_0 = arith.constant 0 : i32
    %c0_i32_1 = arith.constant 0 : i32
    return %c0_i32, %c0_i32_0 : i32, i32
  }
  func.func @transform_9(%arg0: i32, %arg1: i32, %arg2: memref<2xi32, #tpu.memory_space<smem>>) -> (i32, i32) {
    %c0_i32 = arith.constant 0 : i32
    %c0_i32_0 = arith.constant 0 : i32
    %c0_i32_1 = arith.constant 0 : i32
    return %c0_i32, %c0_i32_0 : i32, i32
  }
  func.func @transform_10(%arg0: i32, %arg1: i32, %arg2: memref<2xi32, #tpu.memory_space<smem>>) -> (i32, i32) {
    %c0_i32 = arith.constant 0 : i32
    %c0_i32_0 = arith.constant 0 : i32
    %c0_i32_1 = arith.constant 0 : i32
    return %c0_i32, %c0_i32_0 : i32, i32
  }
  func.func @transform_11(%arg0: i32, %arg1: i32, %arg2: memref<2xi32, #tpu.memory_space<smem>>) -> (i32, i32, i32) {
    %c0_i32 = arith.constant 0 : i32
    %c0_i32_0 = arith.constant 0 : i32
    %c0_i32_1 = arith.constant 0 : i32
    return %arg0, %c0_i32, %c0_i32_0 : i32, i32, i32
  }
  func.func @transform_12(%arg0: i32, %arg1: i32, %arg2: memref<2xi32, #tpu.memory_space<smem>>) -> (i32, i32, i32) {
    %c0_i32 = arith.constant 0 : i32
    %c0_i32_0 = arith.constant 0 : i32
    %c0_i32_1 = arith.constant 0 : i32
    return %arg0, %c0_i32, %c0_i32_0 : i32, i32, i32
  }
}

</mosaic_0001>

<bundles_post_ra>
// kernel: tpu_custom_call.1
= control target key start
LH: loop header
LB: loop body
LE: loop exit
PB: predicated region body
PF: predicated region fallthrough
CT: control target
= control target key end

     0   :  { %s3155_s0 = inlined_call_operand.hbm [shape: s32[2], index: 0, kind: input, shape index: {}]   ;;  %s3156_s1 = inlined_call_operand.hbm [shape: bf16[2,256,128], index: 1, kind: input, shape index: {}]   ;;  %s3157_s2 = inlined_call_operand.hbm [shape: bf16[128,128], index: 2, kind: input, shape index: {}]   ;;  %s3158_s3 = inlined_call_operand.vmem [shape: f32[1,128], index: 3, kind: input, shape index: {}]   ;;  %s3159_s4 = inlined_call_operand.hbm [shape: f32[128,128], index: 4, kind: input, shape index: {}]   ;;  %s3160_s5 = inlined_call_operand.vmem [shape: f32[1,128], index: 5, kind: input, shape index: {}]   ;;  %s3161_s6 = inlined_call_operand.hbm [shape: f32[128,128], index: 6, kind: input, shape index: {}]   ;;  %s3162_s7 = inlined_call_operand.vmem [shape: f32[1,128], index: 7, kind: input, shape index: {}]   ;;  %s3163_s8 = inlined_call_operand.hbm [shape: f32[128,128], index: 8, kind: input, shape index: {}]   ;;  %s3164_s9 = inlined_call_operand.hbm [shape: f32[128,128], index: 9, kind: input, shape index: {}]   ;;  %s3165_s10 = inlined_call_operand.vmem [shape: f32[1,128], index: 10, kind: input, shape index: {}]   ;;  %s3166_s11 = inlined_call_operand.vmem [shape: f32[1,128], index: 11, kind: input, shape index: {}]   ;;  %s3167_s12 = inlined_call_operand.hbm [shape: f32[2,1,128], index: 12, kind: output, shape index: {0}]   ;;  %s3168_s13 = inlined_call_operand.hbm [shape: f32[2,1,128], index: 13, kind: output, shape index: {1}]  }
   0x1   :  { %3180 = sst [smem:[#allocation27_spill]] %s3156_s1  ;;  %s2289_s27 = scalar_lea.hbm %s3155_s0, 16 }
   0x2   :  { %3181 = sst [smem:[#allocation28_spill]] %s3160_s5  ;;  %p2290_p0 = scmp.ne.s32.totalorder %s3155_s0, %s2289_s27 }
   0x3   :  { %3182 = sst [smem:[#allocation29_spill]] %s3162_s7  ;;  %p2293_p1 = scmp.lt.u32.totalorder %s2289_s27, %s3155_s0 }
   0x4   :  { %3183 = sst [smem:[#allocation30_spill]] %s3165_s10 }
   0x5   :  { %3184 = sst [smem:[#allocation31_spill]] %s3166_s11  ;;  %p2295_p2 = pnand %p2293_p1, %p2290_p0 }
   0x6   :  { %3185 = sst [smem:[#allocation32_spill]] %s3167_s12 }
   0x7   :  { %3186 = sst [smem:[#allocation33_spill]] %s3168_s13 }
   0x8   :  { %2298 = shalt.err (!%p2295_p2)  }
   0x9   :  { %s2599_s15 = smov [#allocation4]  }
   0xa   :  { %20 = dma.hbm_to_smem %s3155_s0, 16, %s2599_s15, [#allocation3] }
   0xb   :  { %2549 = dma.done.wait [#allocation3], 16 }
   0xc   :  { %2550 = vsyncadd [#allocation3], 4294967280 }
   0xd   :  { %22 = sfence }
   0xe   :  { %23 = vsyncpa [#allocation6], 0 }
   0xf   :  { %25 = vsyncpa [#allocation6 + $0x1], 0 }
  0x10   :  { %26 = vsyncpa [#allocation9], 0 }
  0x11   :  { %27 = vsyncpa [#allocation12], 0 }
  0x12   :  { %28 = vsyncpa [#allocation15], 0 }
  0x13   :  { %29 = vsyncpa [#allocation7], 0 }
  0x14   :  { %31 = vsyncpa [#allocation7 + $0x1], 0 }
  0x15   :  { %32 = vsyncpa [#allocation18], 0 }
  0x16   :  { %34 = vsyncpa [#allocation18 + $0x1], 0  ;;  %s2697_s18 = smov 0   ;;  %s2699_s19 = smov 0  }
  0x17   :  { %s2701_s20 = smov 0   ;;  %s2703_s21 = smov 0  }
  0x18   :  { %s2705_s0 = smov 0   ;;  %s2707_s22 = smov 0  }
  0x19 LB: > { %3187 = sst [smem:[#allocation26_spill]] %s2589_s21  ;;  %s3169_s23 = sadd.s32 4294967295, %s2597_s22   ;;  %s2597_s22 = sphi %s2707_s22, %s40_s22   ;;  %s2593_s0 = sphi %s2705_s0, %s3219_s0   ;;  %s2589_s21 = sphi %s2703_s21, %s3218_s21   ;;  %s2585_s20 = sphi %s2701_s20, %s3217_s20   ;;  %s2581_s19 = sphi %s2699_s19, %s3216_s19   ;;  %s2577_s18 = sphi %s2697_s18, %s3215_s18  }
  0x1a   : > { %p1716_p3 = scmp.ge.s32.totalorder %s2597_s22, 1  ;;  %p2731_p4 = scmp.eq.s32.totalorder %s3169_s23, 0 }
  0x1b   : > { %p347_p5 = scmp.lt.s32.totalorder %s2597_s22, 3  ;;  %s2600_s26 = smov [#allocation8]  }
  0x1c   : > { %s3188_s24 = scalar_select %p2731_p4, 1, 0 }
  0x1d   : > { %p2736_p6 = pnand %p1716_p3, %p347_p5  ;;  %s359_s27 = sshll.u32 %s2600_s26, 4  ;;  %s360_s27 = int_to_ptr.vmem [resolvable:$true] %s359_s27 }
  0x1e   : > { %s2601_s29 = smov [#allocation11]   ;;  %s2299_s16 = scalar_lea.hbm %s3157_s2, 1024 }
  0x1f   : > { %s3189_s25 = scalar_select %p2736_p6, 1, 0 }
  0x20   : > { %p2165_p7 = pneg %p2736_p6  ;;  %s391_s30 = sshll.u32 %s2601_s29, 4  ;;  %s392_s30 = int_to_ptr.vmem [resolvable:$true] %s391_s30 }
  0x21   : > { %p2300_p10 = scmp.ne.s32.totalorder %s3157_s2, %s2299_s16  ;;  %p2306_p0 = scmp.lt.u32.totalorder %s2299_s16, %s3157_s2 }
  0x22   : > { %p2745_p9 = pnand %p2165_p7, %p2731_p4 }
  0x24   : > { %p2757_p11 = pneg %p2745_p9 }
  0x26   : > { %p2302_p12 = pnand %p2757_p11, %p2300_p10 }
  0x28   : > { %p2303_p13 = pneg %p2302_p12 }
  0x2a   : > { %p2308_p1 = pnand %p2306_p0, %p2303_p13 }
  0x2c   : > { %2311 = shalt.err (!%p2308_p1)
}
  0x2d   : > { %s2312_s29 = scalar_lea.vmem %s360_s27, 1024  ;;  %p2320_p7 = scmp.lt.s32.totalorder %s360_s27, %s360_s27 }
  0x2e   : > { %p2313_p2 = scmp.ne.s32.totalorder %s360_s27, %s2312_s29  ;;  %p2321_p8 = scmp.lt.s32.totalorder %s2312_s29, %s2312_s29 }
  0x30   : > { %p2315_p3 = pnand %p2313_p2, %p2757_p11  ;;  %p2322_p6 = por %p2321_p8, %p2320_p7 }
  0x32   : > { %p2316_p5 = pneg %p2315_p3 }
  0x34   : > { %p2323_p4 = pnand %p2322_p6, %p2316_p5 }
  0x36   : > { %2326 = shalt.err (!%p2323_p4)
}
  0x37   : > { %s3176_s23 = smov 64   ;;  %s3177_s14 = smov 4  }
  0x38   : > { %2168 = dma.hbm_to_vmem [thread:$0]  (!%p2745_p9), %s3157_s2, 1024, %s360_s27, [#allocation9], %s3176_s23, %s3176_s23, %s3177_s14  }
  0x39   : > { %s2604_s15 = smov [#allocation10]   ;;  %s2327_s10 = scalar_lea.hbm %s3161_s6, 2048 }
  0x3a   : > { %s375_s16 = sshll.u32 %s2604_s15, 4  ;;  %p2328_p4 = scmp.ne.s32.totalorder %s3161_s6, %s2327_s10  ;;  %s376_s16 = int_to_ptr.vmem [resolvable:$true] %s375_s16 }
  0x3b   : > { %p2334_p10 = scmp.lt.u32.totalorder %s2327_s10, %s3161_s6 }
  0x3c   : > { %p2330_p6 = pnand %p2328_p4, %p2757_p11 }
  0x3e   : > { %p2331_p8 = pneg %p2330_p6 }
  0x40   : > { %p2336_p12 = pnand %p2334_p10, %p2331_p8 }
  0x42   : > { %2339 = shalt.err (!%p2336_p12)
}
  0x43   : > { %s2340_s27 = scalar_lea.vmem %s392_s30, 2048  ;;  %p2348_p2 = scmp.lt.s32.totalorder %s392_s30, %s392_s30 }
  0x44   : > { %p2341_p13 = scmp.ne.s32.totalorder %s392_s30, %s2340_s27  ;;  %p2349_p3 = scmp.lt.s32.totalorder %s2340_s27, %s2340_s27 }
  0x46   : > { %p2343_p0 = pnand %p2341_p13, %p2757_p11  ;;  %p2350_p5 = por %p2349_p3, %p2348_p2 }
  0x48   : > { %p2344_p1 = pneg %p2343_p0 }
  0x4a   : > { %p2351_p7 = pnand %p2350_p5, %p2344_p1 }
  0x4c   : > { %2354 = shalt.err (!%p2351_p7)
}
  0x4d   : > { %s2605_s7 = smov 128   ;;  %s2606_s12 = smov 8  }
  0x4e   : > { %2174 = dma.hbm_to_vmem [thread:$0]  (!%p2745_p9), %s3161_s6, 2048, %s392_s30, [#allocation12], %s2605_s7, %s2605_s7, %s2606_s12  }
  0x4f   : > { %s2355_s13 = scalar_lea.hbm %s3159_s4, 2048 }
  0x50   : > { %p2356_p4 = scmp.ne.s32.totalorder %s3159_s4, %s2355_s13  ;;  %p2362_p10 = scmp.lt.u32.totalorder %s2355_s13, %s3159_s4 }
  0x52   : > { %p2358_p6 = pnand %p2356_p4, %p2757_p11 }
  0x54   : > { %p2359_p8 = pneg %p2358_p6 }
  0x56   : > { %p2364_p12 = pnand %p2362_p10, %p2359_p8 }
  0x58   : > { %2367 = shalt.err (!%p2364_p12)
}
  0x59   : > { %s2368_s5 = scalar_lea.vmem %s376_s16, 2048  ;;  %p2376_p2 = scmp.lt.s32.totalorder %s376_s16, %s376_s16 }
  0x5a   : > { %p2369_p13 = scmp.ne.s32.totalorder %s376_s16, %s2368_s5  ;;  %p2377_p3 = scmp.lt.s32.totalorder %s2368_s5, %s2368_s5 }
  0x5c   : > { %p2371_p0 = pnand %p2369_p13, %p2757_p11  ;;  %p2378_p5 = por %p2377_p3, %p2376_p2 }
  0x5e   : > { %p2372_p1 = pneg %p2371_p0 }
  0x60   : > { %p2379_p7 = pnand %p2378_p5, %p2372_p1 }
  0x62   : > { %2382 = shalt.err (!%p2379_p7)
}
  0x63   : > { %2171 = dma.hbm_to_vmem [thread:$0]  (!%p2745_p9), %s3159_s4, 2048, %s376_s16, [#allocation9], %s2605_s7, %s2605_s7, %s2606_s12  }
  0x64   : > { %s2607_s21 = smov [#allocation13]   ;;  %s2608_s13 = smov [#allocation14]  }
  0x65   : > { %s407_s11 = sshll.u32 %s2607_s21, 4  ;;  %s420_s15 = sshll.u32 %s2608_s13, 4  ;;  %s408_s11 = int_to_ptr.vmem [resolvable:$true] %s407_s11  ;;  %s421_s15 = int_to_ptr.vmem [resolvable:$true] %s420_s15 }
  0x66   : > { %s2383_s27 = scalar_lea.hbm %s3163_s8, 2048 }
  0x67   : > { %p2384_p4 = scmp.ne.s32.totalorder %s3163_s8, %s2383_s27  ;;  %p2390_p10 = scmp.lt.u32.totalorder %s2383_s27, %s3163_s8 }
  0x69   : > { %p2386_p6 = pnand %p2384_p4, %p2757_p11 }
  0x6b   : > { %p2387_p8 = pneg %p2386_p6 }
  0x6d   : > { %p2392_p12 = pnand %p2390_p10, %p2387_p8 }
  0x6f   : > { %2395 = shalt.err (!%p2392_p12)
}
  0x70   : > { %s2396_s16 = scalar_lea.vmem %s408_s11, 2048  ;;  %p2404_p2 = scmp.lt.s32.totalorder %s408_s11, %s408_s11 }
  0x71   : > { %p2397_p13 = scmp.ne.s32.totalorder %s408_s11, %s2396_s16  ;;  %p2405_p3 = scmp.lt.s32.totalorder %s2396_s16, %s2396_s16 }
  0x73   : > { %p2399_p0 = pnand %p2397_p13, %p2757_p11  ;;  %p2406_p5 = por %p2405_p3, %p2404_p2 }
  0x75   : > { %p2400_p1 = pneg %p2399_p0 }
  0x77   : > { %p2407_p7 = pnand %p2406_p5, %p2400_p1 }
  0x79   : > { %2410 = shalt.err (!%p2407_p7)
}
  0x7a   : > { %2177 = dma.hbm_to_vmem [thread:$0]  (!%p2745_p9), %s3163_s8, 2048, %s408_s11, [#allocation12], %s2605_s7, %s2605_s7, %s2606_s12  }
  0x7b   : > { %s2411_s13 = scalar_lea.hbm %s3164_s9, 2048 }
  0x7c   : > { %p2412_p4 = scmp.ne.s32.totalorder %s3164_s9, %s2411_s13  ;;  %p2418_p10 = scmp.lt.u32.totalorder %s2411_s13, %s3164_s9 }
  0x7e   : > { %p2414_p6 = pnand %p2412_p4, %p2757_p11 }
  0x80   : > { %p2415_p8 = pneg %p2414_p6 }
  0x82   : > { %p2420_p12 = pnand %p2418_p10, %p2415_p8 }
  0x84   : > { %2423 = shalt.err (!%p2420_p12)
}
  0x85   : > { %s2424_s30 = scalar_lea.vmem %s421_s15, 2048  ;;  %p2432_p2 = scmp.lt.s32.totalorder %s421_s15, %s421_s15 }
  0x86   : > { %p2425_p13 = scmp.ne.s32.totalorder %s421_s15, %s2424_s30  ;;  %p2433_p3 = scmp.lt.s32.totalorder %s2424_s30, %s2424_s30 }
  0x88   : > { %p2427_p0 = pnand %p2425_p13, %p2757_p11  ;;  %p2434_p5 = por %p2433_p3, %p2432_p2 }
  0x8a   : > { %p2428_p1 = pneg %p2427_p0 }
  0x8c   : > { %p2435_p7 = pnand %p2434_p5, %p2428_p1 }
  0x8e   : > { %2438 = shalt.err (!%p2435_p7)
}
  0x8f   : > { %2180 = dma.hbm_to_vmem [thread:$0]  (!%p2745_p9), %s3164_s9, 2048, %s421_s15, [#allocation15], %s2605_s7, %s2605_s7, %s2606_s12  }
  0x90   : > { %s1715_s28 = sadd.s32 4294967294, %s2597_s22   ;;  %s52_s26 = sadd.s32 1, %s2593_s0 }
  0x91   : > { %s61_s23 = sadd.s32 1, %s2585_s20  ;;  %p54_p11 = scmp.ge.s32.totalorder %s52_s26, 2 }
  0x92   : > { %p68_p4 = scmp.ne.s32.totalorder %s2585_s20, %s2581_s19  ;;  %p69_p6 = scmp.eq.s32.totalorder %s2597_s22, 0 }
  0x93   : > { %p74_p8 = scmp.ne.s32.totalorder %s2581_s19, %s2577_s18  ;;  %s3221_s26 = smov (%p54_p11, %s52_s26), 0 }
  0x94   : > { %p2870_p10 = por %p69_p6, %p68_p4  ;;  %p3193_p12 = scmp.ne.s32.totalorder %s3188_s24, 0 }
  0x95   : > { %s56_s12 = ssub.s32 %s2593_s0, %s3221_s26  ;;  %s3195_s15 = sadd.s32 4294967295, %s2597_s22  }
  0x96   : > { %p2876_p9 = por %p3193_p12, %p74_p8  ;;  %p308_p13 = scmp.eq.s32.totalorder %s3195_s15, 1 }
  0x97   : > { %p59_p0 = scmp.eq.s32.totalorder %s56_s12, 0  ;;  %p314_p1 = scmp.eq.s32.totalorder %s1715_s28, 1 }
  0x98   : > { %p2884_p2 = por %p308_p13, %p68_p4  ;;  %p2197_p3 = scmp.lt.s32.totalorder %s2597_s22, 2 }
  0x99   : > { %s2890_s21 = scalar_select %p59_p0, %s2585_s20, %s61_s23  }
  0x9a   : > { %s3196_s10 = scalar_select %p2884_p2, 1, 0 }
  0x9b   : > { %p2892_p5 = por %p314_p1, %p74_p8  ;;  %s440_s17 = sand.u32 1, %s2585_s20  }
  0x9c   : > { %s1723_s29 = sshll.u32 %s440_s17, 7  ;;  %s1762_s27 = sshll.u32 %s2593_s0, 11 }
  0x9d   : > { %s3197_s13 = scalar_select %p2892_p5, 1, 0 }
  0x9e   : > { %s3198_s1 = sld [smem:[#allocation27_spill]]  ;;  %s444_s16 = scalar_lea.vmem [#allocation5], %s1723_s29 }
  0x9f   : > { %s453_s28 = sshll.u32 %s444_s16, 4  ;;  %p2907_p7 = pnand %p2197_p3, %p2870_p10  ;;  %s2903_s28 = int_to_ptr.vmem [resolvable:$true] %s453_s28 }
  0xa0   : > { %s2911_s12 = scalar_lea.sflag [#allocation6], %s440_s17 }
  0xa1   : > { %p2441_p4 = pneg %p2907_p7 }
  0xa4   : > { %s2901_s11 = scalar_lea.hbm %s3198_s1, %s1762_s27  ;;  %s2444_s14 = scalar_lea.hbm %s3198_s1, 4096 }
  0xa5   : > { %s2439_s15 = scalar_lea.hbm %s2901_s11, 2048  ;;  %p2445_p10 = scmp.lt.u32.totalorder %s2901_s11, %s3198_s1 }
  0xa6   : > { %p2440_p11 = scmp.ne.s32.totalorder %s2901_s11, %s2439_s15  ;;  %p2446_p12 = scmp.lt.u32.totalorder %s2444_s14, %s2439_s15 }
  0xa7   : > { %p2448_p0 = scmp.lt.u32.totalorder %s2439_s15, %s2901_s11 }
  0xa8   : > { %p2442_p6 = pnand %p2441_p4, %p2440_p11  ;;  %p2447_p13 = por %p2446_p12, %p2445_p10 }
  0xaa   : > { %p2443_p8 = pneg %p2442_p6  ;;  %p2449_p1 = por %p2448_p0, %p2447_p13 }
  0xac   : > { %p2450_p3 = pnand %p2449_p1, %p2443_p8 }
  0xae   : > { %2453 = shalt.err (!%p2450_p3)
}
  0xaf   : > { %s2454_s17 = scalar_lea.vmem %s2903_s28, 2048  ;;  %s2609_s16 = smov [#allocation5]  }
  0xb0   : > { %p2455_p11 = scmp.ne.s32.totalorder %s2903_s28, %s2454_s17  ;;  %s2459_s29 = sshll.u32 %s2609_s16, 4  ;;  %s2460_s29 = int_to_ptr.vmem [resolvable:$false] %s2459_s29 }
  0xb1   : > { %s2461_s27 = scalar_lea.vmem %s2460_s29, 4096  ;;  %p2462_p2 = scmp.lt.s32.totalorder %s2903_s28, %s2460_s29 }
  0xb2   : > { %p2457_p6 = pnand %p2455_p11, %p2441_p4  ;;  %p2463_p10 = scmp.lt.s32.totalorder %s2461_s27, %s2454_s17 }
  0xb4   : > { %p2458_p5 = pneg %p2457_p6  ;;  %p2464_p12 = por %p2463_p10, %p2462_p2 }
  0xb6   : > { %p2465_p13 = pnand %p2464_p12, %p2458_p5 }
  0xb8   : > { %2468 = shalt.err (!%p2465_p13)
}
  0xb9   : > { %s3200_s15 = smov 4   ;;  %s3201_s14 = smov 64  }
  0xba   : > { %2184 = dma.hbm_to_vmem [thread:$0]  (!%p2907_p7), %s2901_s11, 2048, %s2903_s28, %s2911_s12, %s3201_s14, %s3201_s14, %s3200_s15  }
  0xbb   : > { %p3202_p4 = scmp.ne.s32.totalorder %s3189_s25, 0 }
  0xbc   : > { %s2945_s5 = sand.u32 (!%p3202_p4), 1, %s2581_s19  }
  0xbd   : > { %465 = sbr.rel (%p3202_p4) target bundleno = 1191 (0x4a7), region = 64  ;;  %s1727_s30 = sshll.u32 (!%p3202_p4), %s2945_s5, 7 }
  0xbe   : > { %s468_s17 = scalar_lea.sflag (!%p3202_p4), [#allocation6], %s2945_s5  ;;  %s2949_s16 = scalar_lea.vmem (!%p3202_p4), [#allocation5], %s1727_s30 }
  0xc4   : > { %2552 = dma.done.wait (%p2876_p9), %s468_s17, 2048  }
  0xc5   : > { %2554 = vsyncadd (%p2876_p9), %s468_s17, 4294965248  ;;  %p3203_p2 = scmp.ne.s32.totalorder %s3188_s24, 0 }
  0xc7   : > { %2556 = dma.done.wait (%p3203_p2), [#allocation9], 3072  }
  0xc8   : > { %2558 = vsyncadd (%p3203_p2), [#allocation9], 4294964224 }
  0xc9   : > { %2560 = dma.done.wait (%p3203_p2), [#allocation12], 4096  }
  0xca   : > { %2562 = vsyncadd (%p3203_p2), [#allocation12], 4294963200 }
  0xcb   : > { %2564 = dma.done.wait (%p3203_p2), [#allocation15], 2048  }
  0xcc   : > { %2566 = vsyncadd (%p3203_p2), [#allocation15], 4294965248  ;;  %v2265_v0 = vld [vmem:[#allocation8] sm:$0xff]   ;;  %v2266_v1 = vld [vmem:[#allocation8 + $0x8] sm:$0xff]   ;;  %v2610_v27 = vmov 0.0|0.0   ;;  %vm2611_vm0 = vmmov 0  }
  0xcd   : > { %1855 = vmatprep.subr.bf16.mxu0 %v2265_v0  ;;  %v2267_v2 = vld [vmem:[#allocation8 + $0x10] sm:$0xff]   ;;  %v2268_v3 = vld [vmem:[#allocation8 + $0x18] sm:$0xff]   ;;  %v2273_v4 = vld [vmem:[%s2949_s16] sm:$0xff]   ;;  %2043 = vmatprep.subr.bf16.mxu1 %v2610_v27  ;;  %v2612_v45 = vmov 0.0   ;;  %s3204_s28 = sld [smem:[#allocation28_spill]]  ;;  %s3205_s23 = sld [smem:[#allocation26_spill]] }
  0xce   : > { %1856 = vmatpush3.bf16.msra.mxu0 %v2265_v0  ;;  %1871 = vmatprep.mubr.bf16.mxu0 %v2273_v4  ;;  %v2269_v5 = vld [vmem:[#allocation8 + $0x20] sm:$0xff]   ;;  %v2270_v6 = vld [vmem:[#allocation8 + $0x28] sm:$0xff]   ;;  %v2271_v7 = vld [vmem:[#allocation8 + $0x30] sm:$0xff]   ;;  %s3206_s27 = sld [smem:[#allocation29_spill]]  ;;  %s528_s15 = scalar_lea.vmem [#allocation16], %s2945_s5 }
  0xcf   : > { %1857 = vmatprep.subr.bf16.mxu0 %v2266_v1  ;;  %v2272_v8 = vld [vmem:[#allocation8 + $0x38] sm:$0xff]   ;;  %v2274_v9 = vld [vmem:[%s2949_s16 + $0x8] sm:$0xff]   ;;  %v2275_v10 = vld [vmem:[%s2949_s16 + $0x10] sm:$0xff]   ;;  %1935 = vmatprep.mubr.msk.f32.mxu1 %vm2611_vm0, %v2612_v45  ;;  %s1548_s25 = sshll.u32 %s528_s15, 4  ;;  %s1532_s7 = scalar_lea.sflag [#allocation7], %s2945_s5  ;;  %s1549_s25 = int_to_ptr.vmem [resolvable:$true] %s1548_s25 }
  0xd0   : > { %v2276_v11 = vld [vmem:[%s2949_s16 + $0x18] sm:$0xff]   ;;  %v2277_v12 = vld [vmem:[%s2949_s16 + $0x20] sm:$0xff]   ;;  %v2278_v13 = vld [vmem:[%s2949_s16 + $0x28] sm:$0xff]   ;;  %s2469_s11 = scalar_lea.vmem %s1549_s25, 16  ;;  %p3208_p5 = scmp.ne.s32.totalorder %s3196_s10, 0 }
  0xd1   : > { %v2279_v14 = vld [vmem:[%s2949_s16 + $0x30] sm:$0xff]   ;;  %v2280_v15 = vld [vmem:[%s2949_s16 + $0x38] sm:$0xff]   ;;  %v2281_v16 = vld [vmem:[%s2949_s16 + $0x40] sm:$0xff]   ;;  %p2470_p9 = scmp.ne.s32.totalorder %s1549_s25, %s2469_s11 }
  0xd2   : > { %1858 = vmatpush3.bf16.msra.mxu0 %v2266_v1  ;;  %v2282_v17 = vld [vmem:[%s2949_s16 + $0x48] sm:$0xff]   ;;  %v2283_v18 = vld [vmem:[%s2949_s16 + $0x50] sm:$0xff]   ;;  %v2284_v19 = vld [vmem:[%s2949_s16 + $0x58] sm:$0xff]  }
  0xd3   : > { %1859 = vmatprep.subr.bf16.mxu0 %v2267_v2  ;;  %v2285_v20 = vld [vmem:[%s2949_s16 + $0x60] sm:$0xff]   ;;  %v2286_v21 = vld [vmem:[%s2949_s16 + $0x68] sm:$0xff]   ;;  %v2287_v22 = vld [vmem:[%s2949_s16 + $0x70] sm:$0xff]   ;;  %s3179_s14 = sshll.u32 %s3205_s23, 4  ;;  %p2471_p7 = pnand %p2470_p9, %p3208_p5 }
  0xd4   : > { %v2288_v23 = vld [vmem:[%s2949_s16 + $0x78] sm:$0xff]   ;;  %v1174_v24 = vld [vmem:[#allocation10] sm:$0xff]  ;;  %v1175_v25 = vld [vmem:[#allocation10 + $0x8] sm:$0xff]  ;;  %s3207_s16 = sld [smem:[#allocation32_spill]] }
  0xd5   : > { %v2044_v26 = vpack.c.bf16 %v1175_v25, %v1174_v24  ;;  %v1176_v28 = vld [vmem:[#allocation10 + $0x10] sm:$0xff]  ;;  %v1177_v29 = vld [vmem:[#allocation10 + $0x18] sm:$0xff]  ;;  %v1178_v31 = vld [vmem:[#allocation10 + $0x20] sm:$0xff]  ;;  %p2472_p8 = pneg %p2471_p7 }
  0xd6   : > { %1860 = vmatpush3.bf16.msra.mxu0 %v2267_v2  ;;  %v2047_v30 = vpack.c.bf16 %v1177_v29, %v1176_v28  ;;  %v1179_v32 = vld [vmem:[#allocation10 + $0x28] sm:$0xff]  ;;  %v1180_v34 = vld [vmem:[#allocation10 + $0x30] sm:$0xff]  ;;  %v1181_v35 = vld [vmem:[#allocation10 + $0x38] sm:$0xff] }
  0xd7   : > { %1861 = vmatprep.subr.bf16.mxu0 %v2268_v3  ;;  %2045 = vmatpush3.bf16.msra.mxu1 %v2044_v26  ;;  %v2050_v33 = vpack.c.bf16 %v1179_v32, %v1178_v31  ;;  %v2053_v36 = vpack.c.bf16 %v1181_v35, %v1180_v34  ;;  %v1182_v37 = vld [vmem:[#allocation10 + $0x40] sm:$0xff]  ;;  %v1183_v38 = vld [vmem:[#allocation10 + $0x48] sm:$0xff]  ;;  %v1184_v40 = vld [vmem:[#allocation10 + $0x50] sm:$0xff] }
  0xd8   : > { %2046 = vmatprep.subr.bf16.mxu1 %v2610_v27  ;;  %v2056_v39 = vpack.c.bf16 %v1183_v38, %v1182_v37  ;;  %v1185_v41 = vld [vmem:[#allocation10 + $0x58] sm:$0xff]  ;;  %v1186_v42 = vld [vmem:[#allocation10 + $0x60] sm:$0xff]  ;;  %v1187_v44 = vld [vmem:[#allocation10 + $0x68] sm:$0xff] }
  0xd9   : > { %v2059_v43 = vpack.c.bf16 %v1185_v41, %v1184_v40  ;;  %v2062_v46 = vpack.c.bf16 %v1187_v44, %v1186_v42  ;;  %v1188_v47 = vld [vmem:[#allocation10 + $0x70] sm:$0xff]  ;;  %v1189_v48 = vld [vmem:[#allocation10 + $0x78] sm:$0xff]  ;;  %v3000_v50 = vld [vmem:[%s3158_s3] ss:$0 sm:$0xff] }
  0xda   : > { %1862 = vmatpush3.bf16.msra.mxu0 %v2268_v3  ;;  %v2065_v49 = vpack.c.bf16 %v1189_v48, %v1188_v47  ;;  %s3073_s24 = scalar_lea.hbm %s3207_s16, %s3179_s14 }
  0xdb   : > { %1863 = vmatprep.subr.bf16.mxu0 %v2269_v5  ;;  %2048 = vmatpush3.bf16.msra.mxu1 %v2047_v30 }
  0xdc   : > { %2049 = vmatprep.subr.bf16.mxu1 %v2610_v27 }
  0xde   : > { %1864 = vmatpush3.bf16.msra.mxu0 %v2269_v5 }
  0xdf   : > { %1865 = vmatprep.subr.bf16.mxu0 %v2270_v6  ;;  %2051 = vmatpush3.bf16.msra.mxu1 %v2050_v33 }
  0xe0   : > { %2052 = vmatprep.subr.bf16.mxu1 %v2610_v27 }
  0xe2   : > { %1866 = vmatpush3.bf16.msra.mxu0 %v2270_v6 }
  0xe3   : > { %1867 = vmatprep.subr.bf16.mxu0 %v2271_v7  ;;  %2054 = vmatpush3.bf16.msra.mxu1 %v2053_v36 }
  0xe4   : > { %2055 = vmatprep.subr.bf16.mxu1 %v2610_v27 }
  0xe6   : > { %1868 = vmatpush3.bf16.msra.mxu0 %v2271_v7 }
  0xe7   : > { %1869 = vmatprep.subr.bf16.mxu0 %v2272_v8  ;;  %2057 = vmatpush3.bf16.msra.mxu1 %v2056_v39 }
  0xe8   : > { %2058 = vmatprep.subr.bf16.mxu1 %v2610_v27 }
  0xea   : > { %1870 = vmatpush3.bf16.msra.mxu0 %v2272_v8 }
  0xeb   : > { %2091 = vmatprep.subr.bf16.mxu0 %v2610_v27  ;;  %2060 = vmatpush3.bf16.msra.mxu1 %v2059_v43 }
  0xec   : > { %2061 = vmatprep.subr.bf16.mxu1 %v2610_v27 }
  0xed   : > { %1872 = vmatmul.mubr.bf16.vlgmr.msra.gmra.mrb[0].mxu0 %v2274_v9 }
  0xee   : > { %1875 = vmatprep.mubr.bf16.mxu0 %v2275_v10 }
  0xef   : > { %2063 = vmatpush3.bf16.msra.mxu1 %v2062_v46 }
  0xf0   : > { %2064 = vmatprep.subr.bf16.mxu1 %v2610_v27 }
  0xf3   : > { %2066 = vmatpush3.bf16.msra.mxu1 %v2065_v49 }
  0xf4   : > { %2067 = vmatprep.subr.bf16.mxu1 %v2610_v27 }
  0xf5   : > { %1876 = vmatmul.mubr.bf16.gmra.mrb[4].mxu0 %v2276_v11 }
  0xf6   : > { %1879 = vmatprep.mubr.bf16.mxu0 %v2277_v12 }
  0xfd   : > { %1880 = vmatmul.mubr.bf16.gmra.mrb[8].mxu0 %v2278_v13 }
  0xfe   : > { %1883 = vmatprep.mubr.bf16.mxu0 %v2279_v14 }
 0x105   : > { %1884 = vmatmul.mubr.bf16.gmra.mrb[12].mxu0 %v2280_v15 }
 0x106   : > { %1887 = vmatprep.mubr.bf16.mxu0 %v2281_v16 }
 0x10d   : > { %1888 = vmatmul.mubr.bf16.gmra.mrb[16].mxu0 %v2282_v17 }
 0x10e   : > { %1891 = vmatprep.mubr.bf16.mxu0 %v2283_v18 }
 0x115   : > { %1892 = vmatmul.mubr.bf16.gmra.mrb[20].mxu0 %v2284_v19 }
 0x116   : > { %1895 = vmatprep.mubr.bf16.mxu0 %v2285_v20 }
 0x11d   : > { %1896 = vmatmul.mubr.bf16.gmra.mrb[24].mxu0 %v2286_v21 }
 0x11e   : > { %1899 = vmatprep.mubr.bf16.mxu0 %v2287_v22 }
 0x125   : > { %1900 = vmatmul.mubr.bf16.gmra.mrb[28].mxu0 %v2288_v23 }
 0x126   : > { %2005 = vmatprep.mubr.msk.f32.mxu0 %vm2611_vm0, %v2612_v45 }
 0x1c0   : > { %v1873_v51 = vpop.f32.mrb[0].mxu0 }
 0x1c1   : > { %v775_v52 = vpop.f32.mrb[1].mxu0  ;;  %v784_v56 = vadd.f32 %v1873_v51, %v3000_v50 }
 0x1c2   : > { %v776_v53 = vadd.f32 %v3000_v50, %v775_v52  ;;  %v1874_v54 = vpop.f32.mrb[2].mxu0 }
 0x1c3   : > { %v778_v55 = vpop.f32.mrb[3].mxu0  ;;  %v787_v59 = vadd.f32 %v1874_v54, %v3000_v50  ;;  %v904_v61 = vmax.f32 %v784_v56, 0.0 }
 0x1c4   : > { %v779_v57 = vadd.f32 %v3000_v50, %v778_v55  ;;  %v902_v58 = vmax.f32 %v776_v53, 0.0 }
 0x1c5   : > { %v905_v1 = vmax.f32 %v787_v59, 0.0 }
 0x1c6   : > { %v903_v60 = vmax.f32 %v779_v57, 0.0 }
 0x1c8   : > { %v1130_v62 = vadd.f32 %v903_v60, %v902_v58  ;;  %v1877_v63 = vpop.f32.mrb[4].mxu0 }
 0x1c9   : > { %v791_v0 = vpop.f32.mrb[5].mxu0  ;;  %v800_v6 = vadd.f32 %v1877_v63, %v3000_v50 }
 0x1ca   : > { %v1131_v2 = vadd.f32 %v1130_v62, %v904_v61  ;;  %v792_v3 = vadd.f32 %v3000_v50, %v791_v0  ;;  %v1878_v4 = vpop.f32.mrb[6].mxu0 }
 0x1cb   : > { %v794_v5 = vpop.f32.mrb[7].mxu0  ;;  %v803_v11 = vadd.f32 %v1878_v4, %v3000_v50  ;;  %v908_v13 = vmax.f32 %v800_v6, 0.0 }
 0x1cc   : > { %v906_v7 = vmax.f32 %v792_v3, 0.0  ;;  %v1132_v8 = vadd.f32 %v1131_v2, %v905_v1  ;;  %v795_v9 = vadd.f32 %v3000_v50, %v794_v5 }
 0x1cd   : > { %v909_v17 = vmax.f32 %v803_v11, 0.0 }
 0x1ce   : > { %v1133_v10 = vadd.f32 %v1132_v8, %v906_v7  ;;  %v907_v12 = vmax.f32 %v795_v9, 0.0 }
 0x1d0   : > { %v1134_v14 = vadd.f32 %v1133_v10, %v907_v12  ;;  %v1881_v15 = vpop.f32.mrb[8].mxu0 }
 0x1d1   : > { %v807_v16 = vpop.f32.mrb[9].mxu0  ;;  %v816_v22 = vadd.f32 %v1881_v15, %v3000_v50 }
 0x1d2   : > { %v1135_v18 = vadd.f32 %v1134_v14, %v908_v13  ;;  %v808_v19 = vadd.f32 %v3000_v50, %v807_v16  ;;  %v1882_v20 = vpop.f32.mrb[10].mxu0 }
 0x1d3   : > { %v810_v21 = vpop.f32.mrb[11].mxu0  ;;  %v819_v28 = vadd.f32 %v1882_v20, %v3000_v50  ;;  %v912_v30 = vmax.f32 %v816_v22, 0.0 }
 0x1d4   : > { %v910_v23 = vmax.f32 %v808_v19, 0.0  ;;  %v1136_v24 = vadd.f32 %v1135_v18, %v909_v17  ;;  %v811_v25 = vadd.f32 %v3000_v50, %v810_v21 }
 0x1d5   : > { %v913_v34 = vmax.f32 %v819_v28, 0.0 }
 0x1d6   : > { %v1137_v26 = vadd.f32 %v1136_v24, %v910_v23  ;;  %v911_v29 = vmax.f32 %v811_v25, 0.0 }
 0x1d8   : > { %v1138_v31 = vadd.f32 %v1137_v26, %v911_v29  ;;  %v1885_v32 = vpop.f32.mrb[12].mxu0 }
 0x1d9   : > { %v823_v33 = vpop.f32.mrb[13].mxu0  ;;  %v832_v39 = vadd.f32 %v1885_v32, %v3000_v50 }
 0x1da   : > { %v1139_v35 = vadd.f32 %v1138_v31, %v912_v30  ;;  %v824_v36 = vadd.f32 %v3000_v50, %v823_v33  ;;  %v1886_v37 = vpop.f32.mrb[14].mxu0 }
 0x1db   : > { %v826_v38 = vpop.f32.mrb[15].mxu0  ;;  %v835_v44 = vadd.f32 %v1886_v37, %v3000_v50  ;;  %v916_v47 = vmax.f32 %v832_v39, 0.0 }
 0x1dc   : > { %v914_v40 = vmax.f32 %v824_v36, 0.0  ;;  %v1140_v41 = vadd.f32 %v1139_v35, %v913_v34  ;;  %v827_v42 = vadd.f32 %v3000_v50, %v826_v38 }
 0x1dd   : > { %v917_v52 = vmax.f32 %v835_v44, 0.0 }
 0x1de   : > { %v1141_v43 = vadd.f32 %v1140_v41, %v914_v40  ;;  %v915_v46 = vmax.f32 %v827_v42, 0.0 }
 0x1e0   : > { %v1142_v48 = vadd.f32 %v1141_v43, %v915_v46  ;;  %v1889_v49 = vpop.f32.mrb[16].mxu0 }
 0x1e1   : > { %v839_v51 = vpop.f32.mrb[17].mxu0  ;;  %v848_v57 = vadd.f32 %v1889_v49, %v3000_v50 }
 0x1e2   : > { %v1143_v53 = vadd.f32 %v1142_v48, %v916_v47  ;;  %v840_v54 = vadd.f32 %v3000_v50, %v839_v51  ;;  %v1890_v55 = vpop.f32.mrb[18].mxu0 }
 0x1e3   : > { %v842_v56 = vpop.f32.mrb[19].mxu0  ;;  %v851_v62 = vadd.f32 %v1890_v55, %v3000_v50  ;;  %v920_v0 = vmax.f32 %v848_v57, 0.0 }
 0x1e4   : > { %v918_v58 = vmax.f32 %v840_v54, 0.0  ;;  %v1144_v59 = vadd.f32 %v1143_v53, %v917_v52  ;;  %v843_v60 = vadd.f32 %v3000_v50, %v842_v56 }
 0x1e5   : > { %v921_v4 = vmax.f32 %v851_v62, 0.0  ;;  %v1263_v62 = vld [vmem:[#allocation11 + $0x8] sm:$0xff] }
 0x1e6   : > { %v1145_v61 = vadd.f32 %v1144_v59, %v918_v58  ;;  %v919_v63 = vmax.f32 %v843_v60, 0.0 }
 0x1e8   : > { %v1146_v1 = vadd.f32 %v1145_v61, %v919_v63  ;;  %v1893_v2 = vpop.f32.mrb[20].mxu0  ;;  %v1262_v61 = vld [vmem:[#allocation11] sm:$0xff] }
 0x1e9   : > { %v855_v3 = vpop.f32.mrb[21].mxu0  ;;  %v864_v9 = vadd.f32 %v1893_v2, %v3000_v50  ;;  %v1264_v2 = vld [vmem:[#allocation11 + $0x10] sm:$0xff] }
 0x1ea   : > { %v1147_v5 = vadd.f32 %v1146_v1, %v920_v0  ;;  %v856_v6 = vadd.f32 %v3000_v50, %v855_v3  ;;  %v1894_v7 = vpop.f32.mrb[22].mxu0  ;;  %v2068_v0 = vpack.c.bf16 %v1263_v62, %v1262_v61  ;;  %v1265_v3 = vld [vmem:[#allocation11 + $0x18] sm:$0xff]  ;;  %v1442_v61 = vld [vmem:[#allocation14 + $0x28] sm:$0xff] }
 0x1eb   : > { %v858_v8 = vpop.f32.mrb[23].mxu0  ;;  %v867_v14 = vadd.f32 %v1894_v7, %v3000_v50  ;;  %v924_v16 = vmax.f32 %v864_v9, 0.0  ;;  %v1268_v7 = vld [vmem:[#allocation11 + $0x30] sm:$0xff] }
 0x1ec   : > { %v922_v10 = vmax.f32 %v856_v6, 0.0  ;;  %v1148_v11 = vadd.f32 %v1147_v5, %v921_v4  ;;  %v859_v12 = vadd.f32 %v3000_v50, %v858_v8  ;;  %v1266_v4 = vld [vmem:[#allocation11 + $0x20] sm:$0xff]  ;;  %v1267_v5 = vld [vmem:[#allocation11 + $0x28] sm:$0xff]  ;;  %v1269_v8 = vld [vmem:[#allocation11 + $0x38] sm:$0xff] }
 0x1ed   : > { %v925_v20 = vmax.f32 %v867_v14, 0.0  ;;  %v2074_v6 = vpack.c.bf16 %v1267_v5, %v1266_v4  ;;  %v2077_v9 = vpack.c.bf16 %v1269_v8, %v1268_v7  ;;  %v1273_v14 = vld [vmem:[#allocation11 + $0x58] sm:$0xff]  ;;  %v1450_v7 = vld [vmem:[#allocation14 + $0x68] sm:$0xff] }
 0x1ee   : > { %v1149_v13 = vadd.f32 %v1148_v11, %v922_v10  ;;  %v923_v15 = vmax.f32 %v859_v12, 0.0  ;;  %v1270_v10 = vld [vmem:[#allocation11 + $0x40] sm:$0xff]  ;;  %v1271_v11 = vld [vmem:[#allocation11 + $0x48] sm:$0xff]  ;;  %v1448_v4 = vld [vmem:[#allocation14 + $0x58] sm:$0xff] }
 0x1ef   : > { %v2080_v12 = vpack.c.bf16 %v1271_v11, %v1270_v10  ;;  %v1452_v10 = vld [vmem:[#allocation14 + $0x78] sm:$0xff] }
 0x1f0   : > { %v1150_v17 = vadd.f32 %v1149_v13, %v923_v15  ;;  %v1897_v18 = vpop.f32.mrb[24].mxu0  ;;  %v1272_v13 = vld [vmem:[#allocation11 + $0x50] sm:$0xff] }
 0x1f1   : > { %v871_v19 = vpop.f32.mrb[25].mxu0  ;;  %v880_v25 = vadd.f32 %v1897_v18, %v3000_v50  ;;  %v2083_v15 = vpack.c.bf16 %v1273_v14, %v1272_v13 }
 0x1f2   : > { %v1151_v21 = vadd.f32 %v1150_v17, %v924_v16  ;;  %v872_v22 = vadd.f32 %v3000_v50, %v871_v19  ;;  %v1898_v23 = vpop.f32.mrb[26].mxu0  ;;  %v1274_v16 = vld [vmem:[#allocation11 + $0x60] sm:$0xff]  ;;  %v1275_v17 = vld [vmem:[#allocation11 + $0x68] sm:$0xff]  ;;  %v1276_v19 = vld [vmem:[#allocation11 + $0x70] sm:$0xff] }
 0x1f3   : > { %v874_v24 = vpop.f32.mrb[27].mxu0  ;;  %v883_v31 = vadd.f32 %v1898_v23, %v3000_v50  ;;  %v928_v33 = vmax.f32 %v880_v25, 0.0  ;;  %v2086_v18 = vpack.c.bf16 %v1275_v17, %v1274_v16  ;;  %v1351_v23 = vld [vmem:[#allocation13 + $0x8] sm:$0xff] }
 0x1f4   : > { %v926_v26 = vmax.f32 %v872_v22, 0.0  ;;  %v1152_v28 = vadd.f32 %v1151_v21, %v925_v20  ;;  %v875_v29 = vadd.f32 %v3000_v50, %v874_v24  ;;  %v1277_v20 = vld [vmem:[#allocation11 + $0x78] sm:$0xff]  ;;  %v1350_v22 = vld [vmem:[#allocation13] sm:$0xff]  ;;  %v1352_v24 = vld [vmem:[#allocation13 + $0x10] sm:$0xff] }
 0x1f5   : > { %v929_v37 = vmax.f32 %v883_v31, 0.0  ;;  %v2089_v21 = vpack.c.bf16 %v1277_v20, %v1276_v19  ;;  %v2092_v25 = vpack.c.bf16 %v1351_v23, %v1350_v22 }
 0x1f6   : > { %v1153_v30 = vadd.f32 %v1152_v28, %v926_v26  ;;  %v927_v32 = vmax.f32 %v875_v29, 0.0  ;;  %v1353_v26 = vld [vmem:[#allocation13 + $0x18] sm:$0xff]  ;;  %v1354_v29 = vld [vmem:[#allocation13 + $0x20] sm:$0xff] }
 0x1f7   : > { %2093 = vmatpush3.bf16.msra.mxu0 %v2092_v25  ;;  %v2095_v28 = vpack.c.bf16 %v1353_v26, %v1352_v24 }
 0x1f8   : > { %v1154_v34 = vadd.f32 %v1153_v30, %v927_v32  ;;  %v1901_v35 = vpop.f32.mrb[28].mxu0  ;;  %2094 = vmatprep.subr.bf16.mxu0 %v2610_v27  ;;  %v1355_v30 = vld [vmem:[#allocation13 + $0x28] sm:$0xff]  ;;  %v1356_v32 = vld [vmem:[#allocation13 + $0x30] sm:$0xff] }
 0x1f9   : > { %v887_v36 = vpop.f32.mrb[29].mxu0  ;;  %v896_v42 = vadd.f32 %v1901_v35, %v3000_v50  ;;  %v2098_v31 = vpack.c.bf16 %v1355_v30, %v1354_v29  ;;  %v1358_v35 = vld [vmem:[#allocation13 + $0x40] sm:$0xff] }
 0x1fa   : > { %v1155_v38 = vadd.f32 %v1154_v34, %v928_v33  ;;  %v888_v39 = vadd.f32 %v3000_v50, %v887_v36  ;;  %v1902_v40 = vpop.f32.mrb[30].mxu0  ;;  %v1357_v33 = vld [vmem:[#allocation13 + $0x38] sm:$0xff]  ;;  %v1359_v36 = vld [vmem:[#allocation13 + $0x48] sm:$0xff] }
 0x1fb   : > { %v890_v41 = vpop.f32.mrb[31].mxu0  ;;  %v899_v48 = vadd.f32 %v1902_v40, %v3000_v50  ;;  %v932_v51 = vmax.f32 %v896_v42, 0.0  ;;  %2096 = vmatpush3.bf16.msra.mxu0 %v2095_v28  ;;  %v2101_v34 = vpack.c.bf16 %v1357_v33, %v1356_v32  ;;  %v1363_v42 = vld [vmem:[#allocation13 + $0x68] sm:$0xff] }
 0x1fc   : > { %v930_v43 = vmax.f32 %v888_v39, 0.0  ;;  %v1156_v44 = vadd.f32 %v1155_v38, %v929_v37  ;;  %v891_v46 = vadd.f32 %v3000_v50, %v890_v41  ;;  %v2071_v50 = vpack.c.bf16 %v1265_v3, %v1264_v2  ;;  %2097 = vmatprep.subr.bf16.mxu0 %v2610_v27  ;;  %v1360_v38 = vld [vmem:[#allocation13 + $0x50] sm:$0xff]  ;;  %v1361_v39 = vld [vmem:[#allocation13 + $0x58] sm:$0xff]  ;;  %v1362_v41 = vld [vmem:[#allocation13 + $0x60] sm:$0xff] }
 0x1fd   : > { %v933_v53 = vmax.f32 %v899_v48, 0.0  ;;  %v2104_v37 = vpack.c.bf16 %v1359_v36, %v1358_v35  ;;  %v2107_v40 = vpack.c.bf16 %v1361_v39, %v1360_v38  ;;  %v1190_v48 = vld [vmem:[%s3204_s28] sm:$0x1]  ;;  %v1446_v3 = vld [vmem:[#allocation14 + $0x48] sm:$0xff]  ;;  %s2613_s28 = smov [#allocation16]  }
 0x1fe   : > { %v1157_v47 = vadd.f32 %v1156_v44, %v930_v43  ;;  %v931_v49 = vmax.f32 %v891_v46, 0.0  ;;  %v2110_v43 = vpack.c.bf16 %v1363_v42, %v1362_v41  ;;  %v1364_v44 = vld [vmem:[#allocation13 + $0x70] sm:$0xff]  ;;  %v1365_v46 = vld [vmem:[#allocation13 + $0x78] sm:$0xff]  ;;  %v1445_v2 = vld [vmem:[#allocation14 + $0x40] sm:$0xff]  ;;  %s2473_s12 = sshll.u32 %s2613_s28, 4  ;;  %s2474_s12 = int_to_ptr.vmem [resolvable:$false] %s2473_s12 }
 0x1ff   : > { %2099 = vmatpush3.bf16.msra.mxu0 %v2098_v31  ;;  %s2475_s29 = scalar_lea.vmem %s2474_s12, 32  ;;  %p2476_p0 = scmp.lt.s32.totalorder %s1549_s25, %s2474_s12 }
 0x200   : > { %v1158_v52 = vadd.f32 %v1157_v47, %v931_v49  ;;  %2100 = vmatprep.subr.bf16.mxu0 %v2610_v27  ;;  %v2113_v47 = vpack.c.bf16 %v1365_v46, %v1364_v44  ;;  %v1437_v49 = vld [vmem:[#allocation14] sm:$0xff]  ;;  %p2477_p1 = scmp.lt.s32.totalorder %s2475_s29, %s2469_s11 }
 0x202   : > { %v1159_v54 = vadd.f32 %v1158_v52, %v932_v51  ;;  %v1438_v51 = vld [vmem:[#allocation14 + $0x8] sm:$0xff]  ;;  %p2478_p3 = por %p2477_p1, %p2476_p0 }
 0x203   : > { %2102 = vmatpush3.bf16.msra.mxu0 %v2101_v34 }
 0x204   : > { %v1160_v55 = vadd.f32 %v1159_v54, %v933_v53  ;;  %2103 = vmatprep.subr.bf16.mxu0 %v2610_v27  ;;  %p2479_p11 = pnand %p2478_p3, %p2472_p8 }
 0x206   : > { %v1167_v56 = vrot.slane %v1160_v55, 4 }
 0x207   : > { %2105 = vmatpush3.bf16.msra.mxu0 %v2104_v37 }
 0x208   : > { %v1168_v57 = vadd.f32 %v1167_v56, %v1160_v55  ;;  %2106 = vmatprep.subr.bf16.mxu0 %v2610_v27  ;;  %v2116_v55 = vpack.c.bf16 %v1438_v51, %v1437_v49 }
 0x20a   : > { %v1169_v58 = vrot.slane %v1168_v57, 2 }
 0x20b   : > { %2108 = vmatpush3.bf16.msra.mxu0 %v2107_v40 }
 0x20c   : > { %v1170_v59 = vadd.f32 %v1169_v58, %v1168_v57  ;;  %2109 = vmatprep.subr.bf16.mxu0 %v2610_v27  ;;  %v1439_v57 = vld [vmem:[#allocation14 + $0x10] sm:$0xff]  ;;  %v1440_v58 = vld [vmem:[#allocation14 + $0x18] sm:$0xff] }
 0x20e   : > { %v1171_v60 = vrot.slane %v1170_v59, 1 }
 0x20f   : > { %2111 = vmatpush3.bf16.msra.mxu0 %v2110_v43 }
 0x210   : > { %v1172_v63 = vadd.f32 %v1171_v60, %v1170_v59  ;;  %2112 = vmatprep.subr.bf16.mxu0 %v2610_v27  ;;  %v2119_v59 = vpack.c.bf16 %v1440_v58, %v1439_v57  ;;  %v1441_v60 = vld [vmem:[#allocation14 + $0x20] sm:$0xff] }
 0x211   : > { %v2122_v62 = vpack.c.bf16 %v1442_v61, %v1441_v60 }
 0x212   : > { %v1173_v1 = vmul.f32 0.00390625, %v1172_v63  ;;  %v1443_v63 = vld [vmem:[#allocation14 + $0x30] sm:$0xff] }
 0x213   : > { %2114 = vmatpush3.bf16.msra.mxu0 %v2113_v47 }
 0x214   : > { %1936 = vmatmul.mubr.f32.vlgmr.msra.gmra.mrb[0].mxu1 %v1173_v1 }
 0x215   : > { %2069 = vmatpush3.bf16.msra.mxu1 %v2068_v0  ;;  %1970 = vmatprep.mubr.msk.f32.mxu1 %vm2611_vm0, %v2612_v45  ;;  %v1444_v0 = vld [vmem:[#allocation14 + $0x38] sm:$0xff] }
 0x216   : > { %2070 = vmatprep.subr.bf16.mxu1 %v2610_v27  ;;  %v2125_v1 = vpack.c.bf16 %v1444_v0, %v1443_v63 }
 0x219   : > { %2072 = vmatpush3.bf16.msra.mxu1 %v2071_v50  ;;  %v2128_v50 = vpack.c.bf16 %v1446_v3, %v1445_v2 }
 0x21a   : > { %2073 = vmatprep.subr.bf16.mxu1 %v2610_v27 }
 0x21d   : > { %2075 = vmatpush3.bf16.msra.mxu1 %v2074_v6  ;;  %v1449_v6 = vld [vmem:[#allocation14 + $0x60] sm:$0xff] }
 0x21e   : > { %2076 = vmatprep.subr.bf16.mxu1 %v2610_v27  ;;  %v2134_v8 = vpack.c.bf16 %v1450_v7, %v1449_v6 }
 0x221   : > { %2078 = vmatpush3.bf16.msra.mxu1 %v2077_v9  ;;  %v1451_v9 = vld [vmem:[#allocation14 + $0x70] sm:$0xff] }
 0x222   : > { %2079 = vmatprep.subr.bf16.mxu1 %v2610_v27  ;;  %v2137_v11 = vpack.c.bf16 %v1452_v10, %v1451_v9 }
 0x225   : > { %2081 = vmatpush3.bf16.msra.mxu1 %v2080_v12  ;;  %v1278_v12 = vld [vmem:[%s3206_s27] sm:$0x1] }
 0x226   : > { %2082 = vmatprep.subr.bf16.mxu1 %v2610_v27 }
 0x229   : > { %2084 = vmatpush3.bf16.msra.mxu1 %v2083_v15 }
 0x22a   : > { %2085 = vmatprep.subr.bf16.mxu1 %v2610_v27 }
 0x22d   : > { %2087 = vmatpush3.bf16.msra.mxu1 %v2086_v18 }
 0x22e   : > { %2088 = vmatprep.subr.bf16.mxu1 %v2610_v27 }
 0x231   : > { %2090 = vmatpush3.bf16.msra.mxu1 %v2089_v21 }
 0x232   : > { %2115 = vmatprep.subr.bf16.mxu1 %v2610_v27 }
 0x2e7   : > { %v1257_v52 = vpop.f32.mrb[0].mxu1 }
 0x2e8   : > { %v1258_v53 = vadd.f32 %v1257_v52, %v1190_v48  ;;  %v1937_v54 = vpop.f32.mrb[1].mxu1 }
 0x2ea   : > { %v1261_v56 = vmax.f32 %v1258_v53, 0.0 }
 0x2ec   : > { %1971 = vmatmul.mubr.f32.vlgmr.msra.gmra.mrb[2].mxu1 %v1261_v56 }
 0x2ed   : > { %2117 = vmatpush3.bf16.msra.mxu1 %v2116_v55  ;;  %2040 = vmatprep.mubr.msk.f32.mxu1 %vm2611_vm0, %v2612_v45  ;;  %v1447_v45 = vld [vmem:[#allocation14 + $0x50] sm:$0xff] }
 0x2ee   : > { %2118 = vmatprep.subr.bf16.mxu1 %v2610_v27  ;;  %v2131_v5 = vpack.c.bf16 %v1448_v4, %v1447_v45 }
 0x2f1   : > { %2120 = vmatpush3.bf16.msra.mxu1 %v2119_v59 }
 0x2f2   : > { %2121 = vmatprep.subr.bf16.mxu1 %v2610_v27 }
 0x2f5   : > { %2123 = vmatpush3.bf16.msra.mxu1 %v2122_v62 }
 0x2f6   : > { %2124 = vmatprep.subr.bf16.mxu1 %v2610_v27 }
 0x2f9   : > { %2126 = vmatpush3.bf16.msra.mxu1 %v2125_v1 }
 0x2fa   : > { %2127 = vmatprep.subr.bf16.mxu1 %v2610_v27 }
 0x2fd   : > { %2129 = vmatpush3.bf16.msra.mxu1 %v2128_v50 }
 0x2fe   : > { %2130 = vmatprep.subr.bf16.mxu1 %v2610_v27 }
 0x301   : > { %2132 = vmatpush3.bf16.msra.mxu1 %v2131_v5 }
 0x302   : > { %2133 = vmatprep.subr.bf16.mxu1 %v2610_v27 }
 0x305   : > { %2135 = vmatpush3.bf16.msra.mxu1 %v2134_v8 }
 0x306   : > { %2136 = vmatprep.subr.bf16.mxu1 %v2610_v27 }
 0x309   : > { %2138 = vmatpush3.bf16.msra.mxu1 %v2137_v11 }
 0x3bf   : > { %v1345_v13 = vpop.f32.mrb[2].mxu1 }
 0x3c0   : > { %v1346_v14 = vadd.f32 %v1345_v13, %v1278_v12  ;;  %v1972_v15 = vpop.f32.mrb[3].mxu1 }
 0x3c2   : > { %1349 = vst [vmem:[%s528_s15] sm:$0x1] %v1346_v14  ;;  %2006 = vmatmul.mubr.f32.vlgmr.msra.gmra.mrb[32].mxu0 %v1346_v14  ;;  %2041 = vmatmul.mubr.f32.vlgmr.msra.gmra.mrb[4].mxu1 %v1346_v14 }
 0x3c3   : > { %2482 = shalt.err (!%p2479_p11)
}
 0x3c4   : > { %s2483_s27 = scalar_lea.hbm %s3073_s24, 16  ;;  %s2487_s17 = scalar_lea.hbm %s3207_s16, 32 }
 0x3c5   : > { %p2484_p6 = scmp.ne.s32.totalorder %s3073_s24, %s2483_s27  ;;  %p2488_p13 = scmp.lt.u32.totalorder %s3073_s24, %s3207_s16 }
 0x3c6   : > { %p2489_p4 = scmp.lt.u32.totalorder %s2487_s17, %s2483_s27  ;;  %p2491_p9 = scmp.lt.u32.totalorder %s2483_s27, %s3073_s24 }
 0x3c7   : > { %p2485_p10 = pnand %p2484_p6, %p3208_p5 }
 0x3c8   : > { %p2490_p2 = por %p2489_p4, %p2488_p13 }
 0x3c9   : > { %p2486_p12 = pneg %p2485_p10 }
 0x3ca   : > { %p2492_p7 = por %p2491_p9, %p2490_p2 }
 0x3cc   : > { %p2493_p8 = pnand %p2492_p7, %p2486_p12 }
 0x3ce   : > { %2496 = shalt.err (!%p2493_p8)
}
 0x3cf   : > { %2161 = dma.vmem_to_hbm [thread:$0]  (%p3208_p5), %s1549_s25, 16, %s3073_s24, %s1532_s7  }
 0x3d0   : > { %s1524_s11 = sld [smem:[#allocation4 + %s3205_s23]]  ;;  %s534_s14 = scalar_lea.vmem [#allocation17], %s2945_s5 }
 0x3d1   : > { %s3209_s28 = sld [smem:[#allocation30_spill]]  ;;  %s3210_s12 = sld [smem:[#allocation31_spill]] }
 0x3d2   : > { %s1561_s1 = sshll.u32 %s534_s14, 4  ;;  %s3211_s24 = sshll.u32 %s3205_s23, 4  ;;  %s3108_s1 = int_to_ptr.vmem [resolvable:$true] %s1561_s1 }
 0x3d3   : > { %s1536_s15 = scalar_lea.sflag [#allocation18], %s2945_s5  ;;  %s2497_s30 = scalar_lea.vmem %s3108_s1, 16 }
 0x3d4   : > { %p2498_p1 = scmp.ne.s32.totalorder %s3108_s1, %s2497_s30 }
 0x3d6   : > { %p1525_p0 = scmp.eq.s32.totalorder %s1524_s11, 0  ;;  %s3212_s11 = sld [smem:[#allocation33_spill]] }
 0x3d7   : > { %v1366_v16 = vld [vmem:[%s3209_s28] sm:$0x1]  ;;  %p2499_p3 = pnand %p2498_p1, %p3208_p5  ;;  %s2614_s28 = smov [#allocation17]  }
 0x3d8   : > { %s1526_s29 = scalar_select %p1525_p0, 1, 0  ;;  %v1453_v17 = vld [vmem:[%s3210_s12] sm:$0x1] }
 0x3d9   : > { %p2500_p11 = pneg %p2499_p3  ;;  %s2501_s23 = sshll.u32 %s2614_s28, 4  ;;  %s2502_s23 = int_to_ptr.vmem [resolvable:$false] %s2501_s23 }
 0x3da   : > { %v1527_v27 = vstv %s1526_s29  ;;  %s2503_s27 = scalar_lea.vmem %s2502_s23, 32  ;;  %p2504_p6 = scmp.lt.s32.totalorder %s3108_s1, %s2502_s23 }
 0x3db   : > { %vm1528_vm1 = vcmp.eq.s32.totalorder %v1527_v27, 1  ;;  %p2505_p10 = scmp.lt.s32.totalorder %s2503_s27, %s2497_s30 }
 0x3dc   : > { %s3106_s29 = scalar_lea.hbm %s3212_s11, %s3211_s24 }
 0x3dd   : > { %p2506_p12 = por %p2505_p10, %p2504_p6 }
 0x3df   : > { %p2507_p13 = pnand %p2506_p12, %p2500_p11 }
 0x495   : > { %v1433_v18 = vpop.f32.mrb[32].mxu0  ;;  %v1520_v19 = vpop.f32.mrb[4].mxu1 }
 0x496   : > { %v1434_v20 = vadd.f32 %v1433_v18, %v1366_v16  ;;  %v1521_v21 = vadd.f32 %v1520_v19, %v1453_v17  ;;  %v2007_v22 = vpop.f32.mrb[33].mxu0  ;;  %v2042_v23 = vpop.f32.mrb[5].mxu1 }
 0x498   : > { %v1529_v24 = vsel %vm1528_vm1, %v1434_v20, %v1521_v21 }
 0x499   : > { %1530 = vst [vmem:[%s534_s14] sm:$0x1] %v1529_v24 }
 0x49a   : > { %2510 = shalt.err (!%p2507_p13)
}
 0x49b   : > { %s2511_s5 = scalar_lea.hbm %s3106_s29, 16  ;;  %s2515_s12 = scalar_lea.hbm %s3212_s11, 32 }
 0x49c   : > { %p2512_p4 = scmp.ne.s32.totalorder %s3106_s29, %s2511_s5  ;;  %p2516_p7 = scmp.lt.u32.totalorder %s3106_s29, %s3212_s11 }
 0x49d   : > { %p2517_p8 = scmp.lt.u32.totalorder %s2515_s12, %s2511_s5  ;;  %p2519_p1 = scmp.lt.u32.totalorder %s2511_s5, %s3106_s29 }
 0x49e   : > { %p2513_p2 = pnand %p2512_p4, %p3208_p5 }
 0x49f   : > { %p2518_p0 = por %p2517_p8, %p2516_p7 }
 0x4a0   : > { %p2514_p9 = pneg %p2513_p2 }
 0x4a1   : > { %p2520_p3 = por %p2519_p1, %p2518_p0 }
 0x4a3   : > { %p2521_p11 = pnand %p2520_p3, %p2514_p9 }
 0x4a5   : > { %2524 = shalt.err (!%p2521_p11)
}
 0x4a6   : > { %2162 = dma.vmem_to_hbm [thread:$0]  (%p3208_p5), %s3108_s1, 16, %s3106_s29, %s1536_s15  }
 0x4a7 PF: > { %s1573_s7 = sand.u32 1, %s2577_s18   ;;  %p3213_p6 = scmp.ne.s32.totalorder %s3197_s13, 0 }
 0x4a8   : > { %p3214_p10 = scmp.ge.s32.totalorder %s2597_s22, 2  ;;  %s1574_s30 = scalar_lea.sflag [#allocation7], %s1573_s7 }
 0x4aa   : > { %p2186_p12 = pnand %p3214_p10, %p3213_p6 }
 0x4ac   : > { %2568 = dma.done.wait (!%p2186_p12), %s1574_s30, 16  }
 0x4ad   : > { %2570 = vsyncadd (!%p2186_p12), %s1574_s30, 4294967280  ;;  %s1582_s28 = scalar_lea.sflag [#allocation18], %s1573_s7 }
 0x4ae   : > { %2572 = dma.done.wait (!%p2186_p12), %s1582_s28, 16  }
 0x4af   : > { %2574 = vsyncadd (!%p2186_p12), %s1582_s28, 4294967280  ;;  %s40_s22 = sadd.s32 1, %s2597_s22   ;;  %s3215_s18 = smov %s2581_s19 }
 0x4b0   : > { %p37_p13 = scmp.ge.s32.totalorder %s40_s22, 4   ;;  %s3216_s19 = smov %s2585_s20 }
 0x4b1   : > { %s3217_s20 = smov %s2890_s21  ;;  %s3218_s21 = smov %s2593_s0 }
 0x4b2   : > { %s3219_s0 = smov %s3221_s26  ;;  %39 = sbr.rel (!%p37_p13) target bundleno = 25 (0x19), region = 154 }
 0x4b9   :  { %1586 = vsyncpa [#allocation6], 1 }
 0x4ba   :  { %1588 = vsyncpa [#allocation6 + $0x1], 1 }
 0x4bb   :  { %1589 = vsyncpa [#allocation9], 1 }
 0x4bc   :  { %1590 = vsyncpa [#allocation12], 1 }
 0x4bd   :  { %1591 = vsyncpa [#allocation15], 1 }
 0x4be   :  { %1592 = vsyncpa [#allocation7], 1 }
 0x4bf   :  { %1594 = vsyncpa [#allocation7 + $0x1], 1 }
 0x4c0   :  { %1595 = vsyncpa [#allocation18], 1 }
 0x4c1   :  { %1597 = vsyncpa [#allocation18 + $0x1], 1 }

</bundles_post_ra>
